<compile_context>
chip_gen: v6e
topology: v6e:2x2x1
jax: 0.10.0
libtpu: 0.0.40
codegen_flags: <defaults>
</compile_context>

<pallas_src>
import jax
import jax.numpy as jnp
from jax.experimental import pallas as pl
from jax.experimental.pallas import tpu as pltpu

# ---- model hyper-parameters (small, TPU-friendly) ---------------------------
B = 4             # candidate inputs evaluated per pallas_call
L = 2048          # input_length (small stand-in for 16384)
K = 8             # conv kernel size == stride (non-overlapping windows)
C = 128           # conv output channels (lane-aligned)
L_OUT = L // K    # 256 conv output positions
NPARAM = K + 3    # slab columns: K conv taps | bconv | wfc | bfc (one-hot)


def wordcnn_kernel(patches_ref, slab_ref, out_ref):
    # patches_ref: (B, K, L_OUT)  all candidates, lane-dense windows
    # slab_ref   : (C, NPARAM)    packed frozen parameters (one small DMA)
    # out_ref    : (1, B)         one logit per candidate, single lane-row store
    w_t     = slab_ref[:, 0:K]          # (C, K)   Conv1d weight (PyTorch layout)
    bconv   = slab_ref[:, K:K + 1]      # (C, 1)   Conv1d bias
    wfc     = slab_ref[:, K + 1:K + 2]  # (C, 1)   Linear weight
    bfc_col = slab_ref[:, K + 2:K + 3]  # (C, 1)   bfc at row 0, zeros elsewhere

    nb = patches_ref.shape[0]
    # Statically-unrolled candidate loop inside ONE grid step: the (C, K)
    # weights stay resident across all matmuls and each live conv intermediate
    # is only (C, L_OUT) f32 = 32 vregs, so nothing spills.
    pooled_cols = []
    for b in range(nb):
        # Conv1d(stride==kernel) as one MXU matmul -> (C, L_OUT), lane-dense.
        conv_t = jnp.dot(w_t, patches_ref[b],
                         preferred_element_type=jnp.float32)
        conv_t = jnp.maximum(conv_t + bconv, 0.0)                # bias + ReLU
        pooled_cols.append(jnp.max(conv_t, axis=1, keepdims=True))  # (C, 1)
    pooled = jnp.concatenate(pooled_cols, axis=1)                # (C, B)

    # FC layer: sum_c pooled[c,b] * wfc[c] + bfc (bfc folded via one-hot col).
    logits = jnp.sum(pooled * wfc + bfc_col, axis=0, keepdims=True)  # (1, B)
    out_ref[...] = logits


def pack_params(wconv, bconv, wfc, bfc):
    """Pack the frozen WordCNN parameters into one slab (built ONCE, outside
    the fitting loop).  wconv: (C, K) PyTorch Conv1d weight with C_in==1
    squeezed; bconv: (C,); wfc: (C,); bfc: scalar."""
    slab = jnp.zeros((C, NPARAM), jnp.float32)
    slab = slab.at[:, 0:K].set(wconv.astype(jnp.float32))
    slab = slab.at[:, K].set(bconv.astype(jnp.float32))
    slab = slab.at[:, K + 1].set(wfc.astype(jnp.float32))
    slab = slab.at[0, K + 2].set(bfc.astype(jnp.float32))
    return slab


@jax.jit
def wordfit_forward(x_batch, slab):
    """x_batch: (B, L) candidate learnable inputs; slab: precomputed (C, NPARAM)
    frozen-parameter slab from pack_params()."""
    b = x_batch.shape[0]
    # stride == kernel: unfolding into non-overlapping windows is a pure
    # reshape; transpose so windows land on the lane axis (lane-dense).
    patches = x_batch.reshape(b, L_OUT, K).transpose(0, 2, 1).astype(jnp.float32)

    cost = pl.CostEstimate(
        flops=2 * b * C * K * L_OUT,
        transcendentals=0,
        bytes_accessed=b * K * L_OUT * 4 + C * NPARAM * 4 + b * 4,
    )

    out = pl.pallas_call(
        wordcnn_kernel,
        out_shape=jax.ShapeDtypeStruct((1, b), jnp.float32),
        grid=(1,),                      # single grid step: overhead-bound fix
        in_specs=[
            pl.BlockSpec((b, K, L_OUT), lambda i: (0, 0, 0)),
            pl.BlockSpec((C, NPARAM), lambda i: (0, 0)),
        ],
        out_specs=pl.BlockSpec((1, b), lambda i: (0, 0)),
        cost_estimate=cost,
    )(patches, slab)
    return out.reshape(b, 1)


def reference_forward(x_batch, wconv, bconv, wfc, bfc):
    b = x_batch.shape[0]
    patches = x_batch.reshape(b, L_OUT, K).astype(jnp.float32)       # (B, L_OUT, K)
    conv = jnp.einsum("blk,ck->blc", patches, wconv) + bconv         # (B, L_OUT, C)
    conv = jnp.maximum(conv, 0.0)                                    # ReLU
    pooled = jnp.max(conv, axis=1)                                   # (B, C)
    return pooled @ wfc.reshape(C, 1) + bfc                          # (B, 1)


if __name__ == "__main__":
    key = jax.random.PRNGKey(0)
    kx, kw, kb, kfw, kfb = jax.random.split(key, 5)

    # Learnable input(s): same init as the module, rand * 2 - 1 (uniform [-1, 1)).
    # B candidates are evaluated per call; B=1 is exactly the original module.
    x_batch = jax.random.uniform(kx, (B, L), dtype=jnp.float32) * 2.0 - 1.0

    # Frozen synthetic WordCNN parameters (PyTorch layouts, unit dims squeezed).
    wconv = jax.random.normal(kw, (C, K), dtype=jnp.float32) * 0.1   # Conv1d (C,1,K).squeeze(1)
    bconv = jax.random.normal(kb, (C,), dtype=jnp.float32) * 0.01
    wfc = jax.random.normal(kfw, (C,), dtype=jnp.float32) * 0.1      # Linear (1,C).squeeze(0)
    bfc = jax.random.normal(kfb, (), dtype=jnp.float32) * 0.01

    # Constant slab built once, outside the (would-be) fitting loop.
    slab = pack_params(wconv, bconv, wfc, bfc)

    out = wordfit_forward(x_batch, slab)
    jax.block_until_ready(out)

    ref = reference_forward(x_batch, wconv, bconv, wfc, bfc)
    assert jnp.allclose(out, ref, atol=1e-4, rtol=1e-4), (out, ref)

    print("KERNEL_OK")
</pallas_src>

<mosaic_0001>
module attributes {stable_mosaic.version = 11 : i64} {
  func.func @wordcnn_kernel(%arg0: i32, %arg1: memref<4x8x256xf32, #tpu.memory_space<vmem>>, %arg2: memref<128x11xf32, #tpu.memory_space<vmem>>, %arg3: memref<1x4xf32, #tpu.memory_space<vmem>>) attributes {dimension_semantics = [#tpu.dimension_semantics<arbitrary>], iteration_bounds = array<i64: 1>, scalar_prefetch = 0 : i64, scratch_operands = 0 : i64, tpu.core_type = #tpu.core_type<tc>, window_params = [{pipeline_mode = #tpu.pipeline_mode<synchronous>, transform_indices = @transform_0, window_bounds = array<i64: 4, 8, 256>}, {pipeline_mode = #tpu.pipeline_mode<synchronous>, transform_indices = @transform_1, window_bounds = array<i64: 128, 11>}, {pipeline_mode = #tpu.pipeline_mode<synchronous>, transform_indices = @transform_2, window_bounds = array<i64: 1, 4>}]} {
    %c0 = arith.constant 0 : index
    %c0_0 = arith.constant 0 : index
    %0 = vector.load %arg2[%c0, %c0_0] : memref<128x11xf32, #tpu.memory_space<vmem>>, vector<128x8xf32>
    %c0_1 = arith.constant 0 : index
    %c8 = arith.constant 8 : index
    %1 = vector.load %arg2[%c0_1, %c8] : memref<128x11xf32, #tpu.memory_space<vmem>>, vector<128x1xf32>
    %c0_2 = arith.constant 0 : index
    %c9 = arith.constant 9 : index
    %2 = vector.load %arg2[%c0_2, %c9] : memref<128x11xf32, #tpu.memory_space<vmem>>, vector<128x1xf32>
    %c0_3 = arith.constant 0 : index
    %c10 = arith.constant 10 : index
    %3 = vector.load %arg2[%c0_3, %c10] : memref<128x11xf32, #tpu.memory_space<vmem>>, vector<128x1xf32>
    %c0_4 = arith.constant 0 : index
    %c0_5 = arith.constant 0 : index
    %c0_6 = arith.constant 0 : index
    %4 = vector.load %arg1[%c0_4, %c0_5, %c0_6] : memref<4x8x256xf32, #tpu.memory_space<vmem>>, vector<1x8x256xf32>
    %5 = vector.shape_cast %4 : vector<1x8x256xf32> to vector<8x256xf32>
    %cst = arith.constant dense<0.000000e+00> : vector<128x256xf32>
    %6 = tpu.matmul %0, %5, %cst {dimension_numbers = #tpu.dot_dimension_numbers<[1], [0], [0], [1], [0, 0, 1, 1], [], []>} : vector<128x8xf32>, vector<8x256xf32>, vector<128x256xf32> -> vector<128x256xf32>
    %7 = vector.broadcast %1 : vector<128x1xf32> to vector<128x256xf32>
    %8 = arith.addf %6, %7 : vector<128x256xf32>
    %cst_7 = arith.constant 0.000000e+00 : f32
    %9 = vector.broadcast %cst_7 : f32 to vector<128x256xf32>
    %10 = arith.maximumf %8, %9 : vector<128x256xf32>
    %cst_8 = arith.constant dense<0xFF800000> : vector<128xf32>
    %11 = vector.multi_reduction <maximumf>, %10, %cst_8 [1] : vector<128x256xf32> to vector<128xf32>
    %12 = vector.shape_cast %11 : vector<128xf32> to vector<128x1xf32>
    %c1 = arith.constant 1 : index
    %c0_9 = arith.constant 0 : index
    %c0_10 = arith.constant 0 : index
    %13 = vector.load %arg1[%c1, %c0_9, %c0_10] : memref<4x8x256xf32, #tpu.memory_space<vmem>>, vector<1x8x256xf32>
    %14 = vector.shape_cast %13 : vector<1x8x256xf32> to vector<8x256xf32>
    %cst_11 = arith.constant dense<0.000000e+00> : vector<128x256xf32>
    %15 = tpu.matmul %0, %14, %cst_11 {dimension_numbers = #tpu.dot_dimension_numbers<[1], [0], [0], [1], [0, 0, 1, 1], [], []>} : vector<128x8xf32>, vector<8x256xf32>, vector<128x256xf32> -> vector<128x256xf32>
    %16 = vector.broadcast %1 : vector<128x1xf32> to vector<128x256xf32>
    %17 = arith.addf %15, %16 : vector<128x256xf32>
    %cst_12 = arith.constant 0.000000e+00 : f32
    %18 = vector.broadcast %cst_12 : f32 to vector<128x256xf32>
    %19 = arith.maximumf %17, %18 : vector<128x256xf32>
    %cst_13 = arith.constant dense<0xFF800000> : vector<128xf32>
    %20 = vector.multi_reduction <maximumf>, %19, %cst_13 [1] : vector<128x256xf32> to vector<128xf32>
    %21 = vector.shape_cast %20 : vector<128xf32> to vector<128x1xf32>
    %c2 = arith.constant 2 : index
    %c0_14 = arith.constant 0 : index
    %c0_15 = arith.constant 0 : index
    %22 = vector.load %arg1[%c2, %c0_14, %c0_15] : memref<4x8x256xf32, #tpu.memory_space<vmem>>, vector<1x8x256xf32>
    %23 = vector.shape_cast %22 : vector<1x8x256xf32> to vector<8x256xf32>
    %cst_16 = arith.constant dense<0.000000e+00> : vector<128x256xf32>
    %24 = tpu.matmul %0, %23, %cst_16 {dimension_numbers = #tpu.dot_dimension_numbers<[1], [0], [0], [1], [0, 0, 1, 1], [], []>} : vector<128x8xf32>, vector<8x256xf32>, vector<128x256xf32> -> vector<128x256xf32>
    %25 = vector.broadcast %1 : vector<128x1xf32> to vector<128x256xf32>
    %26 = arith.addf %24, %25 : vector<128x256xf32>
    %cst_17 = arith.constant 0.000000e+00 : f32
    %27 = vector.broadcast %cst_17 : f32 to vector<128x256xf32>
    %28 = arith.maximumf %26, %27 : vector<128x256xf32>
    %cst_18 = arith.constant dense<0xFF800000> : vector<128xf32>
    %29 = vector.multi_reduction <maximumf>, %28, %cst_18 [1] : vector<128x256xf32> to vector<128xf32>
    %30 = vector.shape_cast %29 : vector<128xf32> to vector<128x1xf32>
    %c3 = arith.constant 3 : index
    %c0_19 = arith.constant 0 : index
    %c0_20 = arith.constant 0 : index
    %31 = vector.load %arg1[%c3, %c0_19, %c0_20] : memref<4x8x256xf32, #tpu.memory_space<vmem>>, vector<1x8x256xf32>
    %32 = vector.shape_cast %31 : vector<1x8x256xf32> to vector<8x256xf32>
    %cst_21 = arith.constant dense<0.000000e+00> : vector<128x256xf32>
    %33 = tpu.matmul %0, %32, %cst_21 {dimension_numbers = #tpu.dot_dimension_numbers<[1], [0], [0], [1], [0, 0, 1, 1], [], []>} : vector<128x8xf32>, vector<8x256xf32>, vector<128x256xf32> -> vector<128x256xf32>
    %34 = vector.broadcast %1 : vector<128x1xf32> to vector<128x256xf32>
    %35 = arith.addf %33, %34 : vector<128x256xf32>
    %cst_22 = arith.constant 0.000000e+00 : f32
    %36 = vector.broadcast %cst_22 : f32 to vector<128x256xf32>
    %37 = arith.maximumf %35, %36 : vector<128x256xf32>
    %cst_23 = arith.constant dense<0xFF800000> : vector<128xf32>
    %38 = vector.multi_reduction <maximumf>, %37, %cst_23 [1] : vector<128x256xf32> to vector<128xf32>
    %39 = vector.shape_cast %38 : vector<128xf32> to vector<128x1xf32>
    %40 = tpu.concatenate %12, %21, %30, %39 in 1 : vector<128x1xf32>, vector<128x1xf32>, vector<128x1xf32>, vector<128x1xf32> -> vector<128x4xf32>
    %41 = vector.broadcast %2 : vector<128x1xf32> to vector<128x4xf32>
    %42 = arith.mulf %40, %41 : vector<128x4xf32>
    %43 = vector.broadcast %3 : vector<128x1xf32> to vector<128x4xf32>
    %44 = arith.addf %42, %43 : vector<128x4xf32>
    %cst_24 = arith.constant dense<0.000000e+00> : vector<4xf32>
    %45 = vector.multi_reduction <add>, %44, %cst_24 [0] : vector<128x4xf32> to vector<4xf32>
    %46 = vector.shape_cast %45 : vector<4xf32> to vector<1x4xf32>
    %c0_25 = arith.constant 0 : index
    %c0_26 = arith.constant 0 : index
    %47 = vector.load %arg3[%c0_25, %c0_26] : memref<1x4xf32, #tpu.memory_space<vmem>>, vector<1x4xf32>
    tpu.vector_store %arg3[%c0_25, %c0_26], %46 {strides = array<i32>} : memref<1x4xf32, #tpu.memory_space<vmem>>, vector<1x4xf32>,
    return
  }
  func.func @transform_0(%arg0: i32) -> (i32, i32, i32) {
    %c0_i32 = arith.constant 0 : i32
    %c0_i32_0 = arith.constant 0 : i32
    %c0_i32_1 = arith.constant 0 : i32
    %c0_i32_2 = arith.constant 0 : i32
    return %c0_i32, %c0_i32_0, %c0_i32_1 : i32, i32, i32
  }
  func.func @transform_1(%arg0: i32) -> (i32, i32) {
    %c0_i32 = arith.constant 0 : i32
    %c0_i32_0 = arith.constant 0 : i32
    %c0_i32_1 = arith.constant 0 : i32
    return %c0_i32, %c0_i32_0 : i32, i32
  }
  func.func @transform_2(%arg0: i32) -> (i32, i32) {
    %c0_i32 = arith.constant 0 : i32
    %c0_i32_0 = arith.constant 0 : i32
    %c0_i32_1 = arith.constant 0 : i32
    return %c0_i32, %c0_i32_0 : i32, i32
  }
}

</mosaic_0001>

<bundles_post_ra>
// kernel: wordfit_forward.1
= control target key start
LH: loop header
LB: loop body
LE: loop exit
PB: predicated region body
PF: predicated region fallthrough
CT: control target
= control target key end

     0   :  { %vm110_vm0 = vcmask 64512   ;;  %v1494_v5 = vmov 0.0   ;;  %v1495_v11 = vmov 8   ;;  %s2233_s0 = inlined_call_operand.vmem [shape: f32[4,8,256], index: 0, kind: input, shape index: {}]   ;;  %s2234_s1 = inlined_call_operand.vmem [shape: f32[128,11], index: 1, kind: input, shape index: {}]   ;;  %s2235_s2 = inlined_call_operand.hbm [shape: f32[1,4], index: 2, kind: output, shape index: {}]  }
   0x1   :  { %v29_v0 = vld [vmem:[%s2233_s0 + $0x8] sm:$0xff]  ;;  %v1398_v1 = vld [vmem:[%s2233_s0 + $0x18] sm:$0xff]  ;;  %v28_v2 = vld [vmem:[%s2233_s0] sm:$0xff]  ;;  %207 = vmatprep.mubr.f32.mxu0 %v1494_v5  ;;  %451 = vmatprep.mubr.f32.mxu1 %v1494_v5 }
   0x2   :  { %173 = vmatprep.subr.mxu0 %v29_v0  ;;  %417 = vmatprep.subr.mxu1 %v1398_v1  ;;  %v1397_v3 = vld [vmem:[%s2233_s0 + $0x10] sm:$0xff]  ;;  %v1529_v4 = vld [vmem:[%s2234_s1] sm:$0xff]  ;;  %v1416_v6 = vld [vmem:[%s2233_s0 + $0x28] sm:$0xff] }
   0x3   :  { %174 = vmatpush1.msra.mxu0 %v28_v2  ;;  %418 = vmatpush1.msra.mxu1 %v1397_v3  ;;  %v1415_v7 = vld [vmem:[%s2233_s0 + $0x20] sm:$0xff]  ;;  %v1434_v8 = vld [vmem:[%s2233_s0 + $0x38] sm:$0xff]  ;;  %v1550_v9 = vld [vmem:[%s2234_s1 + $0x8] sm:$0xff] }
   0x4   :  { %1381 = vmatmul.mubr.msk.f32.vlgmr.msra.gmra.mxu0 %vm110_vm0, %v1529_v4  ;;  %1399 = vmatmul.mubr.msk.f32.vlgmr.msra.gmra.mxu1 %vm110_vm0, %v1529_v4  ;;  %v1433_v10 = vld [vmem:[%s2233_s0 + $0x30] sm:$0xff] }
   0x5   :  { %661 = vmatprep.subr.mxu0 %v1416_v6  ;;  %213 = vmatprep.mubr.f32.mxu0 %v1494_v5 }
   0x6   :  { %662 = vmatpush1.msra.mxu0 %v1415_v7  ;;  %457 = vmatprep.mubr.f32.mxu1 %v1494_v5 }
   0x7   :  { %905 = vmatprep.subr.mxu1 %v1434_v8  ;;  %1457 = vset.pattern.permute.xlu1 %v1495_v11 }
   0x8   :  { %1382 = vmatmul.mubr.msk.f32.gmra.mxu0 %vm110_vm0, %v1550_v9  ;;  %1400 = vmatmul.mubr.msk.f32.gmra.mxu1 %vm110_vm0, %v1550_v9 }
   0x9   :  { %7 = vsyncpa [#allocation3], 0  ;;  %906 = vmatpush1.msra.mxu1 %v1433_v10  ;;  %219 = vmatprep.mubr.f32.mxu0 %v1494_v5  ;;  %v1564_v12 = vld [vmem:[%s2234_s1 + $0x10] sm:$0xff]  ;;  %v1577_v13 = vld [vmem:[%s2234_s1 + $0x18] sm:$0xff]  ;;  %v1496_v26 = vmov 9   ;;  %v1497_v27 = vmov 10  }
   0xa   :  { %463 = vmatprep.mubr.f32.mxu1 %v1494_v5  ;;  %42 = vperm.xlu1 %1457, %v1564_v12   ;;  %v1590_v14 = vld [vmem:[%s2234_s1 + $0x20] sm:$0xff]  ;;  %v1595_v15 = vld [vmem:[%s2234_s1 + $0x28] sm:$0xff]  ;;  %v1608_v16 = vld [vmem:[%s2234_s1 + $0x38] sm:$0xff]  ;;  %vm1116_vm1 = vcmask 7168   ;;  %vm1133_vm2 = vcmask 15360   ;;  %vm1150_vm3 = vcmask 23552  }
   0xb   :  { %1456 = vset.pattern.permute.xlu0 %v1495_v11  ;;  %v1621_v17 = vld [vmem:[%s2234_s1 + $0x30] sm:$0xff]  ;;  %v1626_v18 = vld [vmem:[%s2234_s1 + $0x48] sm:$0xff]  ;;  %v1633_v19 = vld [vmem:[%s2234_s1 + $0x58] sm:$0xff]  ;;  %vm1327_vm4 = vcmask 31744   ;;  %vm1365_vm5 = vcmask 24576  }
   0xc   :  { %1383 = vmatmul.mubr.msk.f32.gmra.mxu0 %vm110_vm0, %v1564_v12  ;;  %1401 = vmatmul.mubr.msk.f32.gmra.mxu1 %vm110_vm0, %v1564_v12  ;;  %v1644_v20 = vld [vmem:[%s2234_s1 + $0x40] sm:$0xff]  ;;  %v1651_v21 = vld [vmem:[%s2234_s1 + $0x68] sm:$0xff]  ;;  %v1662_v22 = vld [vmem:[%s2234_s1 + $0x50] sm:$0xff] }
   0xd   :  { %225 = vmatprep.mubr.f32.mxu0 %v1494_v5  ;;  %469 = vmatprep.mubr.f32.mxu1 %v1494_v5  ;;  %v1669_v23 = vld [vmem:[%s2234_s1 + $0x78] sm:$0xff]  ;;  %v1680_v24 = vld [vmem:[%s2234_s1 + $0x60] sm:$0xff]  ;;  %v1693_v25 = vld [vmem:[%s2234_s1 + $0x70] sm:$0xff] }
   0xe   :  { %47 = vperm.xlu1 %1457, %v1577_v13   ;;  %32 = vperm.xlu0 %1456, %v1529_v4  }
  0x10   :  { %1384 = vmatmul.mubr.msk.f32.gmra.mxu0 %vm110_vm0, %v1577_v13  ;;  %1402 = vmatmul.mubr.msk.f32.gmra.mxu1 %vm110_vm0, %v1577_v13 }
  0x11   :  { %231 = vmatprep.mubr.f32.mxu0 %v1494_v5  ;;  %475 = vmatprep.mubr.f32.mxu1 %v1494_v5 }
  0x12   :  { %57 = vperm.xlu1 %1457, %v1595_v15   ;;  %37 = vperm.xlu0 %1456, %v1550_v9  }
  0x14   :  { %1385 = vmatmul.mubr.msk.f32.gmra.mxu0 %vm110_vm0, %v1590_v14  ;;  %1403 = vmatmul.mubr.msk.f32.gmra.mxu1 %vm110_vm0, %v1590_v14 }
  0x15   :  { %237 = vmatprep.mubr.f32.mxu0 %v1494_v5  ;;  %481 = vmatprep.mubr.f32.mxu1 %v1494_v5 }
  0x16   :  { %67 = vperm.xlu1 %1457, %v1608_v16   ;;  %52 = vperm.xlu0 %1456, %v1590_v14  }
  0x18   :  { %1386 = vmatmul.mubr.msk.f32.gmra.mxu0 %vm110_vm0, %v1595_v15  ;;  %1404 = vmatmul.mubr.msk.f32.gmra.mxu1 %vm110_vm0, %v1595_v15 }
  0x19   :  { %243 = vmatprep.mubr.f32.mxu0 %v1494_v5  ;;  %487 = vmatprep.mubr.f32.mxu1 %v1494_v5 }
  0x1a   :  { %77 = vperm.xlu1 %1457, %v1626_v18   ;;  %62 = vperm.xlu0 %1456, %v1621_v17  }
  0x1c   :  { %1387 = vmatmul.mubr.msk.f32.gmra.mxu0 %vm110_vm0, %v1621_v17  ;;  %1405 = vmatmul.mubr.msk.f32.gmra.mxu1 %vm110_vm0, %v1621_v17 }
  0x1d   :  { %249 = vmatprep.mubr.f32.mxu0 %v1494_v5  ;;  %493 = vmatprep.mubr.f32.mxu1 %v1494_v5 }
  0x1e   :  { %87 = vperm.xlu1 %1457, %v1633_v19   ;;  %72 = vperm.xlu0 %1456, %v1644_v20  }
  0x20   :  { %1388 = vmatmul.mubr.msk.f32.gmra.mxu0 %vm110_vm0, %v1608_v16  ;;  %1406 = vmatmul.mubr.msk.f32.gmra.mxu1 %vm110_vm0, %v1608_v16 }
  0x21   :  { %255 = vmatprep.mubr.f32.mxu0 %v1494_v5  ;;  %499 = vmatprep.mubr.f32.mxu1 %v1494_v5 }
  0x22   :  { %97 = vperm.xlu1 %1457, %v1651_v21   ;;  %82 = vperm.xlu0 %1456, %v1662_v22  }
  0x24   :  { %1389 = vmatmul.mubr.msk.f32.gmra.mxu0 %vm110_vm0, %v1644_v20  ;;  %1407 = vmatmul.mubr.msk.f32.gmra.mxu1 %vm110_vm0, %v1644_v20 }
  0x25   :  { %261 = vmatprep.mubr.f32.mxu0 %v1494_v5  ;;  %505 = vmatprep.mubr.f32.mxu1 %v1494_v5 }
  0x26   :  { %107 = vperm.xlu1 %1457, %v1669_v23   ;;  %92 = vperm.xlu0 %1456, %v1680_v24  }
  0x28   :  { %1390 = vmatmul.mubr.msk.f32.gmra.mxu0 %vm110_vm0, %v1626_v18  ;;  %1408 = vmatmul.mubr.msk.f32.gmra.mxu1 %vm110_vm0, %v1626_v18 }
  0x29   :  { %267 = vmatprep.mubr.f32.mxu0 %v1494_v5  ;;  %511 = vmatprep.mubr.f32.mxu1 %v1494_v5 }
  0x2a   :  { %1458 = vset.pattern.permute.xlu1 %v1496_v26  ;;  %102 = vperm.xlu0 %1456, %v1693_v25  }
  0x2b   :  { %1168 = vperm.xlu1 %1458, %v1529_v4  }
  0x2c   :  { %1391 = vmatmul.mubr.msk.f32.gmra.mxu0 %vm110_vm0, %v1662_v22  ;;  %1409 = vmatmul.mubr.msk.f32.gmra.mxu1 %vm110_vm0, %v1662_v22 }
  0x2d   :  { %273 = vmatprep.mubr.f32.mxu0 %v1494_v5  ;;  %517 = vmatprep.mubr.f32.mxu1 %v1494_v5 }
  0x2e   :  { %1459 = vset.pattern.permute.xlu0 %v1496_v26 }
  0x2f   :  { %1176 = vperm.xlu1 %1458, %v1564_v12   ;;  %1172 = vperm.xlu0 %1459, %v1550_v9  }
  0x30   :  { %1392 = vmatmul.mubr.msk.f32.gmra.mxu0 %vm110_vm0, %v1633_v19  ;;  %1410 = vmatmul.mubr.msk.f32.gmra.mxu1 %vm110_vm0, %v1633_v19 }
  0x31   :  { %279 = vmatprep.mubr.f32.mxu0 %v1494_v5  ;;  %523 = vmatprep.mubr.f32.mxu1 %v1494_v5 }
  0x33   :  { %1180 = vperm.xlu1 %1458, %v1577_v13   ;;  %1196 = vperm.xlu0 %1459, %v1608_v16  }
  0x34   :  { %1393 = vmatmul.mubr.msk.f32.gmra.mxu0 %vm110_vm0, %v1680_v24  ;;  %1411 = vmatmul.mubr.msk.f32.gmra.mxu1 %vm110_vm0, %v1680_v24 }
  0x35   :  { %285 = vmatprep.mubr.f32.mxu0 %v1494_v5  ;;  %529 = vmatprep.mubr.f32.mxu1 %v1494_v5 }
  0x37   :  { %1184 = vperm.xlu1 %1458, %v1590_v14   ;;  %1208 = vperm.xlu0 %1459, %v1662_v22  }
  0x38   :  { %1394 = vmatmul.mubr.msk.f32.gmra.mxu0 %vm110_vm0, %v1651_v21  ;;  %1412 = vmatmul.mubr.msk.f32.gmra.mxu1 %vm110_vm0, %v1651_v21 }
  0x39   :  { %291 = vmatprep.mubr.f32.mxu0 %v1494_v5  ;;  %535 = vmatprep.mubr.f32.mxu1 %v1494_v5 }
  0x3b   :  { %1460 = vset.pattern.permute.xlu1 %v1497_v27  ;;  %1220 = vperm.xlu0 %1459, %v1651_v21  }
  0x3c   :  { %1395 = vmatmul.mubr.msk.f32.gmra.mxu0 %vm110_vm0, %v1693_v25  ;;  %1413 = vmatmul.mubr.msk.f32.gmra.mxu1 %vm110_vm0, %v1693_v25 }
  0x3d   :  { %297 = vmatprep.mubr.f32.mxu0 %v1494_v5  ;;  %541 = vmatprep.mubr.f32.mxu1 %v1494_v5 }
  0x3e   :  { %1248 = vperm.xlu1 %1460, %v1529_v4  }
  0x3f   :  { %1467 = vset.pattern.permute.xlu0 %v1497_v27 }
  0x40   :  { %1396 = vmatmul.mubr.msk.f32.gmra.mxu0 %vm110_vm0, %v1669_v23  ;;  %1414 = vmatmul.mubr.msk.f32.gmra.mxu1 %vm110_vm0, %v1669_v23 }
  0x41   :  { %695 = vmatprep.mubr.f32.mxu0 %v1494_v5  ;;  %939 = vmatprep.mubr.f32.mxu1 %v1494_v5 }
  0x42   :  { %1252 = vperm.xlu1 %1460, %v1550_v9   ;;  %1264 = vperm.xlu0 %1467, %v1590_v14  }
  0x44   :  { %1417 = vmatmul.mubr.msk.f32.vlgmr.msra.gmra.mxu0 %vm110_vm0, %v1529_v4  ;;  %1435 = vmatmul.mubr.msk.f32.vlgmr.msra.gmra.mxu1 %vm110_vm0, %v1529_v4 }
  0x45   :  { %701 = vmatprep.mubr.f32.mxu0 %v1494_v5  ;;  %945 = vmatprep.mubr.f32.mxu1 %v1494_v5 }
  0x46   :  { %1256 = vperm.xlu1 %1460, %v1564_v12   ;;  %1276 = vperm.xlu0 %1467, %v1608_v16  }
  0x48   :  { %1418 = vmatmul.mubr.msk.f32.gmra.mxu0 %vm110_vm0, %v1550_v9  ;;  %1436 = vmatmul.mubr.msk.f32.gmra.mxu1 %vm110_vm0, %v1550_v9 }
  0x49   :  { %707 = vmatprep.mubr.f32.mxu0 %v1494_v5  ;;  %951 = vmatprep.mubr.f32.mxu1 %v1494_v5 }
  0x4a   :  { %1260 = vperm.xlu1 %1460, %v1577_v13   ;;  %1288 = vperm.xlu0 %1467, %v1662_v22  }
  0x4c   :  { %1419 = vmatmul.mubr.msk.f32.gmra.mxu0 %vm110_vm0, %v1564_v12  ;;  %1437 = vmatmul.mubr.msk.f32.gmra.mxu1 %vm110_vm0, %v1564_v12 }
  0x4d   :  { %713 = vmatprep.mubr.f32.mxu0 %v1494_v5  ;;  %957 = vmatprep.mubr.f32.mxu1 %v1494_v5 }
  0x4e   :  { %1461 = vset.pattern.permute.xlu1 %v1496_v26  ;;  %1300 = vperm.xlu0 %1467, %v1651_v21  }
  0x4f   :  { %1188 = vperm.xlu1 %1461, %v1595_v15  }
  0x50   :  { %1420 = vmatmul.mubr.msk.f32.gmra.mxu0 %vm110_vm0, %v1577_v13  ;;  %1438 = vmatmul.mubr.msk.f32.gmra.mxu1 %vm110_vm0, %v1577_v13 }
  0x51   :  { %719 = vmatprep.mubr.f32.mxu0 %v1494_v5  ;;  %963 = vmatprep.mubr.f32.mxu1 %v1494_v5 }
  0x53   :  { %1192 = vperm.xlu1 %1461, %v1621_v17  }
  0x54   :  { %1421 = vmatmul.mubr.msk.f32.gmra.mxu0 %vm110_vm0, %v1590_v14  ;;  %1439 = vmatmul.mubr.msk.f32.gmra.mxu1 %vm110_vm0, %v1590_v14 }
  0x55   :  { %725 = vmatprep.mubr.f32.mxu0 %v1494_v5  ;;  %969 = vmatprep.mubr.f32.mxu1 %v1494_v5 }
  0x57   :  { %1462 = vset.pattern.permute.xlu1 %v1497_v27 }
  0x58   :  { %1422 = vmatmul.mubr.msk.f32.gmra.mxu0 %vm110_vm0, %v1595_v15  ;;  %1440 = vmatmul.mubr.msk.f32.gmra.mxu1 %vm110_vm0, %v1595_v15 }
  0x59   :  { %731 = vmatprep.mubr.f32.mxu0 %v1494_v5  ;;  %975 = vmatprep.mubr.f32.mxu1 %v1494_v5 }
  0x5a   :  { %1268 = vperm.xlu1 %1462, %v1595_v15  }
  0x5c   :  { %1423 = vmatmul.mubr.msk.f32.gmra.mxu0 %vm110_vm0, %v1621_v17  ;;  %1441 = vmatmul.mubr.msk.f32.gmra.mxu1 %vm110_vm0, %v1621_v17 }
  0x5d   :  { %737 = vmatprep.mubr.f32.mxu0 %v1494_v5  ;;  %981 = vmatprep.mubr.f32.mxu1 %v1494_v5 }
  0x5e   :  { %1272 = vperm.xlu1 %1462, %v1621_v17  }
  0x60   :  { %1424 = vmatmul.mubr.msk.f32.gmra.mxu0 %vm110_vm0, %v1608_v16  ;;  %1442 = vmatmul.mubr.msk.f32.gmra.mxu1 %vm110_vm0, %v1608_v16 }
  0x61   :  { %743 = vmatprep.mubr.f32.mxu0 %v1494_v5  ;;  %987 = vmatprep.mubr.f32.mxu1 %v1494_v5 }
  0x62   :  { %1463 = vset.pattern.permute.xlu1 %v1496_v26 }
  0x63   :  { %1200 = vperm.xlu1 %1463, %v1644_v20  }
  0x64   :  { %1425 = vmatmul.mubr.msk.f32.gmra.mxu0 %vm110_vm0, %v1644_v20  ;;  %1443 = vmatmul.mubr.msk.f32.gmra.mxu1 %vm110_vm0, %v1644_v20 }
  0x65   :  { %749 = vmatprep.mubr.f32.mxu0 %v1494_v5  ;;  %993 = vmatprep.mubr.f32.mxu1 %v1494_v5 }
  0x67   :  { %1204 = vperm.xlu1 %1463, %v1626_v18  }
  0x68   :  { %1426 = vmatmul.mubr.msk.f32.gmra.mxu0 %vm110_vm0, %v1626_v18  ;;  %1444 = vmatmul.mubr.msk.f32.gmra.mxu1 %vm110_vm0, %v1626_v18 }
  0x69   :  { %755 = vmatprep.mubr.f32.mxu0 %v1494_v5  ;;  %999 = vmatprep.mubr.f32.mxu1 %v1494_v5 }
  0x6b   :  { %1464 = vset.pattern.permute.xlu1 %v1497_v27 }
  0x6c   :  { %1427 = vmatmul.mubr.msk.f32.gmra.mxu0 %vm110_vm0, %v1662_v22  ;;  %1445 = vmatmul.mubr.msk.f32.gmra.mxu1 %vm110_vm0, %v1662_v22 }
  0x6d   :  { %761 = vmatprep.mubr.f32.mxu0 %v1494_v5  ;;  %1005 = vmatprep.mubr.f32.mxu1 %v1494_v5 }
  0x6e   :  { %1280 = vperm.xlu1 %1464, %v1644_v20  }
  0x70   :  { %1428 = vmatmul.mubr.msk.f32.gmra.mxu0 %vm110_vm0, %v1633_v19  ;;  %1446 = vmatmul.mubr.msk.f32.gmra.mxu1 %vm110_vm0, %v1633_v19 }
  0x71   :  { %767 = vmatprep.mubr.f32.mxu0 %v1494_v5  ;;  %1011 = vmatprep.mubr.f32.mxu1 %v1494_v5 }
  0x72   :  { %1284 = vperm.xlu1 %1464, %v1626_v18  }
  0x74   :  { %1429 = vmatmul.mubr.msk.f32.gmra.mxu0 %vm110_vm0, %v1680_v24  ;;  %1447 = vmatmul.mubr.msk.f32.gmra.mxu1 %vm110_vm0, %v1680_v24 }
  0x75   :  { %773 = vmatprep.mubr.f32.mxu0 %v1494_v5  ;;  %1017 = vmatprep.mubr.f32.mxu1 %v1494_v5 }
  0x76   :  { %1465 = vset.pattern.permute.xlu1 %v1496_v26 }
  0x77   :  { %1212 = vperm.xlu1 %1465, %v1633_v19  }
  0x78   :  { %1430 = vmatmul.mubr.msk.f32.gmra.mxu0 %vm110_vm0, %v1651_v21  ;;  %1448 = vmatmul.mubr.msk.f32.gmra.mxu1 %vm110_vm0, %v1651_v21 }
  0x79   :  { %779 = vmatprep.mubr.f32.mxu0 %v1494_v5  ;;  %1023 = vmatprep.mubr.f32.mxu1 %v1494_v5 }
  0x7b   :  { %1216 = vperm.xlu1 %1465, %v1680_v24  }
  0x7c   :  { %1431 = vmatmul.mubr.msk.f32.gmra.mxu0 %vm110_vm0, %v1693_v25  ;;  %1449 = vmatmul.mubr.msk.f32.gmra.mxu1 %vm110_vm0, %v1693_v25 }
  0x7d   :  { %785 = vmatprep.mubr.f32.mxu0 %v1494_v5  ;;  %1029 = vmatprep.mubr.f32.mxu1 %v1494_v5 }
  0x7f   :  { %1466 = vset.pattern.permute.xlu1 %v1497_v27 }
  0x80   :  { %1432 = vmatmul.mubr.msk.f32.gmra.mxu0 %vm110_vm0, %v1669_v23  ;;  %1450 = vmatmul.mubr.msk.f32.gmra.mxu1 %vm110_vm0, %v1669_v23 }
  0x81   :  { %1292 = vperm.xlu1 %1466, %v1633_v19  }
  0x85   :  { %1296 = vperm.xlu1 %1466, %v1680_v24   ;;  %v1868_v28 = vpop.permute.xlu1 %42 }
  0x89   :  { %1468 = vset.pattern.permute.xlu1 %v1496_v26  ;;  %v1870_v29 = vpop.permute.xlu1 %47  ;;  %v1878_v33 = vpop.permute.xlu0 %32 }
  0x8a   :  { %1224 = vperm.xlu1 %1468, %v1693_v25  }
  0x8d   :  { %v1872_v30 = vpop.permute.xlu1 %57  ;;  %v1886_v45 = vpop.permute.xlu0 %37 }
  0x8e   :  { %1228 = vperm.xlu1 %1468, %v1669_v23  }
  0x91   :  { %v1874_v31 = vpop.permute.xlu1 %67  ;;  %v1903_v25 = vpop.permute.xlu0 %52 }
  0x92   :  { %1469 = vset.pattern.permute.xlu1 %v1497_v27 }
  0x95   :  { %v1876_v32 = vpop.permute.xlu1 %77 }
  0x99   :  { %v1882_v40 = vpop.permute.xlu1 %87 }
  0x9d   :  { %v1892_v60 = vpop.permute.xlu1 %97 }
  0xa1   :  { %v1899_v18 = vpop.permute.xlu1 %107 }
  0xc4   :  { %v209_v34 = vpop.f32.mrf.mxu0  ;;  %v453_v35 = vpop.f32.mrf.mxu1 }
  0xc5   :  { %v210_v36 = vadd.f32 %v209_v34, %v1878_v33  ;;  %v454_v37 = vadd.f32 %v453_v35, %v1878_v33 }
  0xc6   :  { %v211_v38 = vpop.f32.mrf.mxu0  ;;  %v455_v39 = vpop.f32.mrf.mxu1 }
  0xc7   :  { %v212_v41 = vadd.f32 %v211_v38, %v1878_v33  ;;  %v456_v42 = vadd.f32 %v455_v39, %v1878_v33  ;;  %v304_v48 = vmax.f32 %v210_v36, 0.0  ;;  %v548_v49 = vmax.f32 %v454_v37, 0.0  ;;  %v1907_v38 = vpop.permute.xlu1 %1168 }
  0xc8   :  { %v215_v43 = vpop.f32.mrf.mxu0  ;;  %v459_v44 = vpop.f32.mrf.mxu1 }
  0xc9   :  { %v305_v46 = vmax.f32 %v212_v41, 0.0  ;;  %v549_v47 = vmax.f32 %v456_v42, 0.0  ;;  %v216_v50 = vadd.f32 %v215_v43, %v1886_v45  ;;  %v460_v51 = vadd.f32 %v459_v44, %v1886_v45 }
  0xca   :  { %v217_v52 = vpop.f32.mrf.mxu0  ;;  %v461_v53 = vpop.f32.mrf.mxu1 }
  0xcb   :  { %v218_v54 = vadd.f32 %v217_v52, %v1886_v45  ;;  %v462_v55 = vadd.f32 %v461_v53, %v1886_v45  ;;  %v580_v58 = vmax.f32 %v548_v49, %v549_v47  ;;  %v336_v59 = vmax.f32 %v304_v48, %v305_v46 }
  0xcc   :  { %v221_v56 = vpop.f32.mrf.mxu0  ;;  %v465_v57 = vpop.f32.mrf.mxu1  ;;  %v306_v63 = vmax.f32 %v216_v50, 0.0  ;;  %v550_v0 = vmax.f32 %v460_v51, 0.0 }
  0xcd   :  { %v307_v61 = vmax.f32 %v218_v54, 0.0  ;;  %v551_v62 = vmax.f32 %v462_v55, 0.0  ;;  %v222_v1 = vadd.f32 %v221_v56, %v1868_v28  ;;  %v466_v2 = vadd.f32 %v465_v57, %v1868_v28  ;;  %581 = vmax.xlane.f32.xlu1 %v580_v58  ;;  %337 = vmax.xlane.f32.xlu0 %v336_v59 }
  0xce   :  { %v223_v3 = vpop.f32.mrf.mxu0  ;;  %v467_v4 = vpop.f32.mrf.mxu1 }
  0xcf   :  { %v224_v5 = vadd.f32 %v223_v3, %v1868_v28  ;;  %v468_v6 = vadd.f32 %v467_v4, %v1868_v28  ;;  %v339_v9 = vmax.f32 %v306_v63, %v307_v61  ;;  %v583_v10 = vmax.f32 %v550_v0, %v551_v62  ;;  %v1915_v62 = vpop.permute.xlu0 %62  ;;  %v1917_v63 = vpop.permute.xlu1 %1176 }
  0xd0   :  { %v227_v7 = vpop.f32.mrf.mxu0  ;;  %v471_v8 = vpop.f32.mrf.mxu1  ;;  %v308_v13 = vmax.f32 %v222_v1, 0.0  ;;  %v552_v14 = vmax.f32 %v466_v2, 0.0 }
  0xd1   :  { %v309_v11 = vmax.f32 %v224_v5, 0.0  ;;  %v553_v12 = vmax.f32 %v468_v6, 0.0  ;;  %v228_v15 = vadd.f32 %v227_v7, %v1870_v29  ;;  %340 = vmax.xlane.f32.xlu1 %v339_v9  ;;  %584 = vmax.xlane.f32.xlu0 %v583_v10  ;;  %v472_v34 = vadd.f32 %v471_v8, %v1870_v29 }
  0xd2   :  { %v229_v16 = vpop.f32.mrf.mxu0  ;;  %v473_v17 = vpop.f32.mrf.mxu1 }
  0xd3   :  { %v230_v19 = vadd.f32 %v229_v16, %v1870_v29  ;;  %v474_v20 = vadd.f32 %v473_v17, %v1870_v29  ;;  %v586_v23 = vmax.f32 %v552_v14, %v553_v12  ;;  %v342_v24 = vmax.f32 %v308_v13, %v309_v11 }
  0xd4   :  { %v233_v21 = vpop.f32.mrf.mxu0  ;;  %v477_v22 = vpop.f32.mrf.mxu1  ;;  %v310_v27 = vmax.f32 %v228_v15, 0.0  ;;  %v554_v48 = vmax.f32 %v472_v34, 0.0 }
  0xd5   :  { %v311_v26 = vmax.f32 %v230_v19, 0.0  ;;  %v234_v35 = vadd.f32 %v233_v21, %v1903_v25  ;;  %587 = vmax.xlane.f32.xlu1 %v586_v23  ;;  %343 = vmax.xlane.f32.xlu0 %v342_v24  ;;  %v555_v41 = vmax.f32 %v474_v20, 0.0  ;;  %v478_v50 = vadd.f32 %v477_v22, %v1903_v25  ;;  %v1925_v22 = vpop.permute.xlu1 %1180 }
  0xd6   :  { %v235_v36 = vpop.f32.mrf.mxu0  ;;  %v479_v37 = vpop.f32.mrf.mxu1 }
  0xd7   :  { %v236_v39 = vadd.f32 %v235_v36, %v1903_v25  ;;  %v480_v42 = vadd.f32 %v479_v37, %v1903_v25  ;;  %v345_v46 = vmax.f32 %v310_v27, %v311_v26  ;;  %v312_v49 = vmax.f32 %v234_v35, 0.0  ;;  %v1929_v37 = vpop.permute.xlu0 %72 }
  0xd8   :  { %v239_v43 = vpop.f32.mrf.mxu0  ;;  %v483_v44 = vpop.f32.mrf.mxu1  ;;  %v589_v61 = vmax.f32 %v554_v48, %v555_v41  ;;  %v556_v1 = vmax.f32 %v478_v50, 0.0 }
  0xd9   :  { %v313_v47 = vmax.f32 %v236_v39, 0.0  ;;  %v240_v51 = vadd.f32 %v239_v43, %v1872_v30  ;;  %346 = vmax.xlane.f32.xlu0 %v345_v46  ;;  %v557_v55 = vmax.f32 %v480_v42, 0.0  ;;  %v484_v3 = vadd.f32 %v483_v44, %v1872_v30 }
  0xda   :  { %v241_v52 = vpop.f32.mrf.mxu0  ;;  %v485_v53 = vpop.f32.mrf.mxu1 }
  0xdb   :  { %v242_v54 = vadd.f32 %v241_v52, %v1872_v30  ;;  %v486_v56 = vadd.f32 %v485_v53, %v1872_v30  ;;  %v348_v59 = vmax.f32 %v312_v49, %v313_v47  ;;  %v314_v2 = vmax.f32 %v240_v51, 0.0 }
  0xdc   :  { %v245_v57 = vpop.f32.mrf.mxu0  ;;  %v489_v58 = vpop.f32.mrf.mxu1  ;;  %v592_v12 = vmax.f32 %v556_v1, %v557_v55  ;;  %v558_v15 = vmax.f32 %v484_v3, 0.0 }
  0xdd   :  { %v315_v0 = vmax.f32 %v242_v54, 0.0  ;;  %v246_v4 = vadd.f32 %v245_v57, %v1915_v62  ;;  %349 = vmax.xlane.f32.xlu1 %v348_v59  ;;  %590 = vmax.xlane.f32.xlu0 %v589_v61  ;;  %v559_v8 = vmax.f32 %v486_v56, 0.0  ;;  %v490_v17 = vadd.f32 %v489_v58, %v1915_v62  ;;  %v1935_v55 = vpop.permute.xlu1 %1184 }
  0xde   :  { %v247_v5 = vpop.f32.mrf.mxu0  ;;  %v491_v6 = vpop.f32.mrf.mxu1 }
  0xdf   :  { %v248_v7 = vadd.f32 %v247_v5, %v1915_v62  ;;  %v492_v9 = vadd.f32 %v491_v6, %v1915_v62  ;;  %v351_v13 = vmax.f32 %v314_v2, %v315_v0  ;;  %v316_v16 = vmax.f32 %v246_v4, 0.0 }
  0xe0   :  { %v251_v10 = vpop.f32.mrf.mxu0  ;;  %v495_v11 = vpop.f32.mrf.mxu1  ;;  %v595_v36 = vmax.f32 %v558_v15, %v559_v8  ;;  %v560_v41 = vmax.f32 %v490_v17, 0.0 }
  0xe1   :  { %v317_v14 = vmax.f32 %v248_v7, 0.0  ;;  %v252_v19 = vadd.f32 %v251_v10, %v1874_v31  ;;  %593 = vmax.xlane.f32.xlu1 %v592_v12  ;;  %352 = vmax.xlane.f32.xlu0 %v351_v13  ;;  %v561_v24 = vmax.f32 %v492_v9, 0.0  ;;  %v496_v43 = vadd.f32 %v495_v11, %v1874_v31  ;;  %v1941_v9 = vpop.permute.xlu0 %82  ;;  %v1945_v17 = vpop.permute.xlu1 %1248 }
  0xe2   :  { %v253_v20 = vpop.f32.mrf.mxu0  ;;  %v497_v21 = vpop.f32.mrf.mxu1 }
  0xe3   :  { %v254_v23 = vadd.f32 %v253_v20, %v1874_v31  ;;  %v498_v26 = vadd.f32 %v497_v21, %v1874_v31  ;;  %v354_v35 = vmax.f32 %v316_v16, %v317_v14  ;;  %v318_v42 = vmax.f32 %v252_v19, 0.0 }
  0xe4   :  { %v257_v27 = vpop.f32.mrf.mxu0  ;;  %v501_v34 = vpop.f32.mrf.mxu1  ;;  %v598_v53 = vmax.f32 %v560_v41, %v561_v24  ;;  %v562_v57 = vmax.f32 %v496_v43, 0.0 }
  0xe5   :  { %v319_v39 = vmax.f32 %v254_v23, 0.0  ;;  %v258_v44 = vadd.f32 %v257_v27, %v1929_v37  ;;  %355 = vmax.xlane.f32.xlu1 %v354_v35  ;;  %596 = vmax.xlane.f32.xlu0 %v595_v36  ;;  %v563_v49 = vmax.f32 %v498_v26, 0.0  ;;  %v502_v59 = vadd.f32 %v501_v34, %v1929_v37 }
  0xe6   :  { %v259_v46 = vpop.f32.mrf.mxu0  ;;  %v503_v47 = vpop.f32.mrf.mxu1 }
  0xe7   :  { %v260_v48 = vadd.f32 %v259_v46, %v1929_v37  ;;  %v504_v50 = vadd.f32 %v503_v47, %v1929_v37  ;;  %v357_v54 = vmax.f32 %v318_v42, %v319_v39  ;;  %v320_v58 = vmax.f32 %v258_v44, 0.0 }
  0xe8   :  { %v263_v51 = vpop.f32.mrf.mxu0  ;;  %v507_v52 = vpop.f32.mrf.mxu1  ;;  %v601_v8 = vmax.f32 %v562_v57, %v563_v49  ;;  %v564_v11 = vmax.f32 %v502_v59, 0.0 }
  0xe9   :  { %v321_v56 = vmax.f32 %v260_v48, 0.0  ;;  %v264_v61 = vadd.f32 %v263_v51, %v1876_v32  ;;  %599 = vmax.xlane.f32.xlu1 %v598_v53  ;;  %358 = vmax.xlane.f32.xlu0 %v357_v54  ;;  %v565_v3 = vmax.f32 %v504_v50, 0.0  ;;  %v508_v13 = vadd.f32 %v507_v52, %v1876_v32  ;;  %v1953_v52 = vpop.permute.xlu0 %92  ;;  %v1955_v53 = vpop.permute.xlu1 %1252 }
  0xea   :  { %v265_v0 = vpop.f32.mrf.mxu0  ;;  %v509_v1 = vpop.f32.mrf.mxu1 }
  0xeb   :  { %v266_v2 = vadd.f32 %v265_v0, %v1876_v32  ;;  %v510_v4 = vadd.f32 %v509_v1, %v1876_v32  ;;  %v360_v7 = vmax.f32 %v320_v58, %v321_v56  ;;  %v322_v12 = vmax.f32 %v264_v61, 0.0 }
  0xec   :  { %v269_v5 = vpop.f32.mrf.mxu0  ;;  %v513_v6 = vpop.f32.mrf.mxu1  ;;  %v604_v26 = vmax.f32 %v564_v11, %v565_v3  ;;  %v566_v35 = vmax.f32 %v508_v13, 0.0 }
  0xed   :  { %v323_v10 = vmax.f32 %v266_v2, 0.0  ;;  %v270_v14 = vadd.f32 %v269_v5, %v1941_v9  ;;  %361 = vmax.xlane.f32.xlu1 %v360_v7  ;;  %602 = vmax.xlane.f32.xlu0 %v601_v8  ;;  %v567_v20 = vmax.f32 %v510_v4, 0.0  ;;  %v514_v39 = vadd.f32 %v513_v6, %v1941_v9 }
  0xee   :  { %v271_v15 = vpop.f32.mrf.mxu0  ;;  %v515_v16 = vpop.f32.mrf.mxu1 }
  0xef   :  { %v272_v19 = vadd.f32 %v271_v15, %v1941_v9  ;;  %v516_v21 = vadd.f32 %v515_v16, %v1941_v9  ;;  %v363_v27 = vmax.f32 %v322_v12, %v323_v10  ;;  %v324_v36 = vmax.f32 %v270_v14, 0.0  ;;  %v1963_v16 = vpop.permute.xlu1 %1256 }
  0xf0   :  { %v275_v23 = vpop.f32.mrf.mxu0  ;;  %v519_v24 = vpop.f32.mrf.mxu1  ;;  %v607_v51 = vmax.f32 %v566_v35, %v567_v20  ;;  %v568_v56 = vmax.f32 %v514_v39, 0.0 }
  0xf1   :  { %v325_v34 = vmax.f32 %v272_v19, 0.0  ;;  %v276_v41 = vadd.f32 %v275_v23, %v1882_v40  ;;  %605 = vmax.xlane.f32.xlu1 %v604_v26  ;;  %364 = vmax.xlane.f32.xlu0 %v363_v27  ;;  %v569_v46 = vmax.f32 %v516_v21, 0.0  ;;  %v520_v58 = vadd.f32 %v519_v24, %v1882_v40 }
  0xf2   :  { %v277_v42 = vpop.f32.mrf.mxu0  ;;  %v521_v43 = vpop.f32.mrf.mxu1 }
  0xf3   :  { %v278_v44 = vadd.f32 %v277_v42, %v1882_v40  ;;  %v522_v47 = vadd.f32 %v521_v43, %v1882_v40  ;;  %v366_v50 = vmax.f32 %v324_v36, %v325_v34  ;;  %v326_v57 = vmax.f32 %v276_v41, 0.0  ;;  %v1967_v34 = vpop.permute.xlu0 %102 }
  0xf4   :  { %v281_v48 = vpop.f32.mrf.mxu0  ;;  %v525_v49 = vpop.f32.mrf.mxu1  ;;  %v610_v6 = vmax.f32 %v568_v56, %v569_v46  ;;  %v570_v10 = vmax.f32 %v520_v58, 0.0 }
  0xf5   :  { %v327_v54 = vmax.f32 %v278_v44, 0.0  ;;  %v282_v59 = vadd.f32 %v281_v48, %v1953_v52  ;;  %367 = vmax.xlane.f32.xlu1 %v366_v50  ;;  %608 = vmax.xlane.f32.xlu0 %v607_v51  ;;  %v571_v2 = vmax.f32 %v522_v47, 0.0  ;;  %v526_v12 = vadd.f32 %v525_v49, %v1953_v52  ;;  %v1973_v56 = vpop.permute.xlu1 %1260 }
  0xf6   :  { %v283_v61 = vpop.f32.mrf.mxu0  ;;  %v527_v0 = vpop.f32.mrf.mxu1 }
  0xf7   :  { %v284_v1 = vadd.f32 %v283_v61, %v1953_v52  ;;  %v528_v3 = vadd.f32 %v527_v0, %v1953_v52  ;;  %v369_v7 = vmax.f32 %v326_v57, %v327_v54  ;;  %v328_v11 = vmax.f32 %v282_v59, 0.0 }
  0xf8   :  { %v287_v4 = vpop.f32.mrf.mxu0  ;;  %v531_v5 = vpop.f32.mrf.mxu1  ;;  %v613_v27 = vmax.f32 %v570_v10, %v571_v2  ;;  %v572_v36 = vmax.f32 %v526_v12, 0.0 }
  0xf9   :  { %v329_v8 = vmax.f32 %v284_v1, 0.0  ;;  %v288_v13 = vadd.f32 %v287_v4, %v1892_v60  ;;  %611 = vmax.xlane.f32.xlu1 %v610_v6  ;;  %370 = vmax.xlane.f32.xlu0 %v369_v7  ;;  %v573_v20 = vmax.f32 %v528_v3, 0.0  ;;  %v532_v41 = vadd.f32 %v531_v5, %v1892_v60 }
  0xfa   :  { %v289_v14 = vpop.f32.mrf.mxu0  ;;  %v533_v15 = vpop.f32.mrf.mxu1 }
  0xfb   :  { %v290_v19 = vadd.f32 %v289_v14, %v1892_v60  ;;  %v534_v21 = vadd.f32 %v533_v15, %v1892_v60  ;;  %v372_v26 = vmax.f32 %v328_v11, %v329_v8  ;;  %v330_v39 = vmax.f32 %v288_v13, 0.0  ;;  %v1979_v11 = vpop.permute.xlu1 %1188 }
  0xfc   :  { %v293_v23 = vpop.f32.mrf.mxu0  ;;  %v537_v24 = vpop.f32.mrf.mxu1  ;;  %v616_v51 = vmax.f32 %v572_v36, %v573_v20  ;;  %v574_v58 = vmax.f32 %v532_v41, 0.0 }
  0xfd   :  { %v331_v35 = vmax.f32 %v290_v19, 0.0  ;;  %v294_v42 = vadd.f32 %v293_v23, %v1967_v34  ;;  %373 = vmax.xlane.f32.xlu1 %v372_v26  ;;  %614 = vmax.xlane.f32.xlu0 %v613_v27  ;;  %v575_v47 = vmax.f32 %v534_v21, 0.0  ;;  %v538_v61 = vadd.f32 %v537_v24, %v1967_v34 }
  0xfe   :  { %v295_v43 = vpop.f32.mrf.mxu0  ;;  %v539_v44 = vpop.f32.mrf.mxu1 }
  0xff   :  { %v296_v46 = vadd.f32 %v295_v43, %v1967_v34  ;;  %v540_v48 = vadd.f32 %v539_v44, %v1967_v34  ;;  %v375_v54 = vmax.f32 %v330_v39, %v331_v35  ;;  %v332_v59 = vmax.f32 %v294_v42, 0.0 }
 0x100   :  { %v299_v49 = vpop.f32.mrf.mxu0  ;;  %v543_v50 = vpop.f32.mrf.mxu1  ;;  %v619_v10 = vmax.f32 %v574_v58, %v575_v47  ;;  %v576_v13 = vmax.f32 %v538_v61, 0.0 }
 0x101   :  { %v333_v57 = vmax.f32 %v296_v46, 0.0  ;;  %v300_v0 = vadd.f32 %v299_v49, %v1899_v18  ;;  %617 = vmax.xlane.f32.xlu1 %v616_v51  ;;  %376 = vmax.xlane.f32.xlu0 %v375_v54  ;;  %v577_v4 = vmax.f32 %v540_v48, 0.0  ;;  %v544_v15 = vadd.f32 %v543_v50, %v1899_v18  ;;  %v1987_v49 = vpop.permute.xlu1 %1192 }
 0x102   :  { %v301_v1 = vpop.f32.mrf.mxu0  ;;  %v545_v2 = vpop.f32.mrf.mxu1 }
 0x103   :  { %v302_v3 = vadd.f32 %v301_v1, %v1899_v18  ;;  %v546_v5 = vadd.f32 %v545_v2, %v1899_v18  ;;  %v378_v8 = vmax.f32 %v332_v59, %v333_v57  ;;  %v334_v14 = vmax.f32 %v300_v0, 0.0 }
 0x104   :  { %v697_v6 = vpop.f32.mrf.mxu0  ;;  %v941_v7 = vpop.f32.mrf.mxu1  ;;  %v622_v36 = vmax.f32 %v576_v13, %v577_v4  ;;  %v578_v42 = vmax.f32 %v544_v15, 0.0 }
 0x105   :  { %v335_v12 = vmax.f32 %v302_v3, 0.0  ;;  %v698_v19 = vadd.f32 %v697_v6, %v1878_v33  ;;  %379 = vmax.xlane.f32.xlu1 %v378_v8  ;;  %620 = vmax.xlane.f32.xlu0 %v619_v10  ;;  %v579_v24 = vmax.f32 %v546_v5, 0.0  ;;  %v942_v44 = vadd.f32 %v941_v7, %v1878_v33  ;;  %v1995_v15 = vpop.permute.xlu1 %1268 }
 0x106   :  { %v699_v20 = vpop.f32.mrf.mxu0  ;;  %v943_v21 = vpop.f32.mrf.mxu1 }
 0x107   :  { %v700_v23 = vadd.f32 %v699_v20, %v1878_v33  ;;  %v944_v26 = vadd.f32 %v943_v21, %v1878_v33  ;;  %v381_v39 = vmax.f32 %v334_v14, %v335_v12  ;;  %v792_v43 = vmax.f32 %v698_v19, 0.0 }
 0x108   :  { %v703_v27 = vpop.f32.mrf.mxu0  ;;  %v947_v35 = vpop.f32.mrf.mxu1  ;;  %v625_v61 = vmax.f32 %v578_v42, %v579_v24  ;;  %v1036_v1 = vmax.f32 %v942_v44, 0.0 }
 0x109   :  { %v793_v41 = vmax.f32 %v700_v23, 0.0  ;;  %v704_v46 = vadd.f32 %v703_v27, %v1886_v45  ;;  %623 = vmax.xlane.f32.xlu1 %v622_v36  ;;  %382 = vmax.xlane.f32.xlu0 %v381_v39  ;;  %v1037_v51 = vmax.f32 %v944_v26, 0.0  ;;  %v948_v2 = vadd.f32 %v947_v35, %v1886_v45 }
 0x10a   :  { %v705_v47 = vpop.f32.mrf.mxu0  ;;  %v949_v48 = vpop.f32.mrf.mxu1 }
 0x10b   :  { %v706_v50 = vadd.f32 %v705_v47, %v1886_v45  ;;  %v950_v54 = vadd.f32 %v949_v48, %v1886_v45  ;;  %v824_v59 = vmax.f32 %v792_v43, %v793_v41  ;;  %v794_v33 = vmax.f32 %v704_v46, 0.0 }
 0x10c   :  { %v709_v57 = vpop.f32.mrf.mxu0  ;;  %v953_v58 = vpop.f32.mrf.mxu1  ;;  %v1068_v13 = vmax.f32 %v1036_v1, %v1037_v51  ;;  %v1038_v20 = vmax.f32 %v948_v2, 0.0 }
 0x10d   :  { %v795_v0 = vmax.f32 %v706_v50, 0.0  ;;  %v710_v3 = vadd.f32 %v709_v57, %v1868_v28  ;;  %825 = vmax.xlane.f32.xlu1 %v824_v59  ;;  %626 = vmax.xlane.f32.xlu0 %v625_v61  ;;  %v1039_v7 = vmax.f32 %v950_v54, 0.0  ;;  %v954_v21 = vadd.f32 %v953_v58, %v1868_v28  ;;  %v2003_v54 = vpop.permute.xlu1 %1272 }
 0x10e   :  { %v711_v4 = vpop.f32.mrf.mxu0  ;;  %v955_v5 = vpop.f32.mrf.mxu1 }
 0x10f   :  { %v712_v6 = vadd.f32 %v711_v4, %v1868_v28  ;;  %v956_v8 = vadd.f32 %v955_v5, %v1868_v28  ;;  %v827_v14 = vmax.f32 %v794_v33, %v795_v0  ;;  %v796_v45 = vmax.f32 %v710_v3, 0.0 }
 0x110   :  { %v715_v10 = vpop.f32.mrf.mxu0  ;;  %v959_v12 = vpop.f32.mrf.mxu1  ;;  %v1071_v43 = vmax.f32 %v1038_v20, %v1039_v7  ;;  %v1040_v47 = vmax.f32 %v954_v21, 0.0 }
 0x111   :  { %v797_v19 = vmax.f32 %v712_v6, 0.0  ;;  %v716_v23 = vadd.f32 %v715_v10, %v1870_v29  ;;  %1069 = vmax.xlane.f32.xlu1 %v1068_v13  ;;  %828 = vmax.xlane.f32.xlu0 %v827_v14  ;;  %v1041_v35 = vmax.f32 %v956_v8, 0.0  ;;  %v960_v48 = vadd.f32 %v959_v12, %v1870_v29 }
 0x112   :  { %v717_v24 = vpop.f32.mrf.mxu0  ;;  %v961_v26 = vpop.f32.mrf.mxu1 }
 0x113   :  { %v718_v27 = vadd.f32 %v717_v24, %v1870_v29  ;;  %v962_v36 = vadd.f32 %v961_v26, %v1870_v29  ;;  %v830_v42 = vmax.f32 %v796_v45, %v797_v19  ;;  %v798_v28 = vmax.f32 %v716_v23, 0.0  ;;  %v2011_v45 = vpop.permute.xlu1 %1200 }
 0x114   :  { %v721_v39 = vpop.f32.mrf.mxu0  ;;  %v965_v41 = vpop.f32.mrf.mxu1  ;;  %v1074_v1 = vmax.f32 %v1040_v47, %v1041_v35  ;;  %v1042_v4 = vmax.f32 %v960_v48, 0.0 }
 0x115   :  { %v799_v44 = vmax.f32 %v718_v27, 0.0  ;;  %v722_v46 = vadd.f32 %v721_v39, %v1903_v25  ;;  %831 = vmax.xlane.f32.xlu1 %v830_v42  ;;  %1072 = vmax.xlane.f32.xlu0 %v1071_v43  ;;  %v1043_v58 = vmax.f32 %v962_v36, 0.0  ;;  %v966_v29 = vadd.f32 %v965_v41, %v1903_v25 }
 0x116   :  { %v723_v50 = vpop.f32.mrf.mxu0  ;;  %v967_v51 = vpop.f32.mrf.mxu1 }
 0x117   :  { %v724_v57 = vadd.f32 %v723_v50, %v1903_v25  ;;  %v968_v59 = vadd.f32 %v967_v51, %v1903_v25  ;;  %v833_v33 = vmax.f32 %v798_v28, %v799_v44  ;;  %v800_v2 = vmax.f32 %v722_v46, 0.0 }
 0x118   :  { %v727_v61 = vpop.f32.mrf.mxu0  ;;  %v971_v0 = vpop.f32.mrf.mxu1  ;;  %v1077_v20 = vmax.f32 %v1042_v4, %v1043_v58  ;;  %v1044_v25 = vmax.f32 %v966_v29, 0.0 }
 0x119   :  { %v801_v3 = vmax.f32 %v724_v57, 0.0  ;;  %v728_v5 = vadd.f32 %v727_v61, %v1872_v30  ;;  %1075 = vmax.xlane.f32.xlu1 %v1074_v1  ;;  %834 = vmax.xlane.f32.xlu0 %v833_v33  ;;  %v1045_v10 = vmax.f32 %v968_v59, 0.0  ;;  %v972_v24 = vadd.f32 %v971_v0, %v1872_v30  ;;  %v2019_v58 = vpop.permute.xlu1 %1204 }
 0x11a   :  { %v729_v6 = vpop.f32.mrf.mxu0  ;;  %v973_v7 = vpop.f32.mrf.mxu1 }
 0x11b   :  { %v836_v8 = vmax.f32 %v800_v2, %v801_v3  ;;  %v730_v12 = vadd.f32 %v729_v6, %v1872_v30  ;;  %v974_v13 = vadd.f32 %v973_v7, %v1872_v30  ;;  %v802_v23 = vmax.f32 %v728_v5, 0.0 }
 0x11c   :  { %v733_v14 = vpop.f32.mrf.mxu0  ;;  %v977_v19 = vpop.f32.mrf.mxu1  ;;  %v1080_v39 = vmax.f32 %v1044_v25, %v1045_v10  ;;  %v1046_v48 = vmax.f32 %v972_v24, 0.0 }
 0x11d   :  { %v734_v21 = vadd.f32 %v733_v14, %v1915_v62  ;;  %v803_v26 = vmax.f32 %v730_v12, 0.0  ;;  %837 = vmax.xlane.f32.xlu1 %v836_v8  ;;  %1078 = vmax.xlane.f32.xlu0 %v1077_v20  ;;  %v1047_v41 = vmax.f32 %v974_v13, 0.0  ;;  %v978_v50 = vadd.f32 %v977_v19, %v1915_v62  ;;  %v2027_v25 = vpop.permute.xlu0 %1172 }
 0x11e   :  { %v735_v27 = vpop.f32.mrf.mxu0  ;;  %v979_v35 = vpop.f32.mrf.mxu1 }
 0x11f   :  { %v736_v36 = vadd.f32 %v735_v27, %v1915_v62  ;;  %v980_v42 = vadd.f32 %v979_v35, %v1915_v62  ;;  %v839_v46 = vmax.f32 %v802_v23, %v803_v26  ;;  %v804_v47 = vmax.f32 %v734_v21, 0.0  ;;  %v2029_v23 = vpop.permute.xlu1 %1280 }
 0x120   :  { %v739_v43 = vpop.f32.mrf.mxu0  ;;  %v983_v44 = vpop.f32.mrf.mxu1  ;;  %v1083_v3 = vmax.f32 %v1046_v48, %v1047_v41  ;;  %v1048_v62 = vmax.f32 %v978_v50, 0.0 }
 0x121   :  { %v805_v28 = vmax.f32 %v736_v36, 0.0  ;;  %v740_v30 = vadd.f32 %v739_v43, %v1874_v31  ;;  %1081 = vmax.xlane.f32.xlu1 %v1080_v39  ;;  %840 = vmax.xlane.f32.xlu0 %v839_v46  ;;  %v1049_v61 = vmax.f32 %v980_v42, 0.0  ;;  %v984_v5 = vadd.f32 %v983_v44, %v1874_v31 }
 0x122   :  { %v741_v51 = vpop.f32.mrf.mxu0  ;;  %v985_v57 = vpop.f32.mrf.mxu1 }
 0x123   :  { %v842_v59 = vmax.f32 %v804_v47, %v805_v28  ;;  %v742_v0 = vadd.f32 %v741_v51, %v1874_v31  ;;  %v986_v1 = vadd.f32 %v985_v57, %v1874_v31  ;;  %v806_v29 = vmax.f32 %v740_v30, 0.0 }
 0x124   :  { %v745_v33 = vpop.f32.mrf.mxu0  ;;  %v989_v2 = vpop.f32.mrf.mxu1  ;;  %v1086_v12 = vmax.f32 %v1048_v62, %v1049_v61  ;;  %v1050_v26 = vmax.f32 %v984_v5, 0.0 }
 0x125   :  { %v746_v4 = vadd.f32 %v745_v33, %v1929_v37  ;;  %v807_v6 = vmax.f32 %v742_v0, 0.0  ;;  %843 = vmax.xlane.f32.xlu1 %v842_v59  ;;  %1084 = vmax.xlane.f32.xlu0 %v1083_v3  ;;  %v1051_v13 = vmax.f32 %v986_v1, 0.0  ;;  %v990_v27 = vadd.f32 %v989_v2, %v1929_v37  ;;  %v2037_v61 = vpop.permute.xlu0 %1196  ;;  %v2039_v0 = vpop.permute.xlu1 %1284 }
 0x126   :  { %v747_v7 = vpop.f32.mrf.mxu0  ;;  %v991_v8 = vpop.f32.mrf.mxu1 }
 0x127   :  { %v748_v10 = vadd.f32 %v747_v7, %v1929_v37  ;;  %v992_v14 = vadd.f32 %v991_v8, %v1929_v37  ;;  %v845_v21 = vmax.f32 %v806_v29, %v807_v6  ;;  %v808_v24 = vmax.f32 %v746_v4, 0.0 }
 0x128   :  { %v751_v19 = vpop.f32.mrf.mxu0  ;;  %v995_v20 = vpop.f32.mrf.mxu1  ;;  %v1089_v28 = vmax.f32 %v1050_v26, %v1051_v13  ;;  %v1052_v50 = vmax.f32 %v990_v27, 0.0 }
 0x129   :  { %v809_v31 = vmax.f32 %v748_v10, 0.0  ;;  %v752_v35 = vadd.f32 %v751_v19, %v1876_v32  ;;  %1087 = vmax.xlane.f32.xlu1 %v1086_v12  ;;  %846 = vmax.xlane.f32.xlu0 %v845_v21  ;;  %v1053_v42 = vmax.f32 %v992_v14, 0.0  ;;  %v996_v37 = vadd.f32 %v995_v20, %v1876_v32  ;;  %v2047_v26 = vpop.permute.xlu0 %1208  ;;  %v2049_v27 = vpop.permute.xlu1 %1212 }
 0x12a   :  { %v753_v36 = vpop.f32.mrf.mxu0  ;;  %v997_v39 = vpop.f32.mrf.mxu1 }
 0x12b   :  { %v848_v41 = vmax.f32 %v808_v24, %v809_v31  ;;  %v754_v43 = vadd.f32 %v753_v36, %v1876_v32  ;;  %v998_v44 = vadd.f32 %v997_v39, %v1876_v32  ;;  %v810_v30 = vmax.f32 %v752_v35, 0.0 }
 0x12c   :  { %v757_v46 = vpop.f32.mrf.mxu0  ;;  %v1001_v47 = vpop.f32.mrf.mxu1  ;;  %v1092_v33 = vmax.f32 %v1052_v50, %v1053_v42  ;;  %v1054_v6 = vmax.f32 %v996_v37, 0.0 }
 0x12d   :  { %v758_v48 = vadd.f32 %v757_v46, %v1941_v9  ;;  %v811_v51 = vmax.f32 %v754_v43, 0.0  ;;  %849 = vmax.xlane.f32.xlu1 %v848_v41  ;;  %1090 = vmax.xlane.f32.xlu0 %v1089_v28  ;;  %v1055_v2 = vmax.f32 %v998_v44, 0.0  ;;  %v1002_v7 = vadd.f32 %v1001_v47, %v1941_v9 }
 0x12e   :  { %v759_v57 = vpop.f32.mrf.mxu0  ;;  %v1003_v59 = vpop.f32.mrf.mxu1 }
 0x12f   :  { %v760_v1 = vadd.f32 %v759_v57, %v1941_v9  ;;  %v1004_v3 = vadd.f32 %v1003_v59, %v1941_v9  ;;  %v851_v29 = vmax.f32 %v810_v30, %v811_v51  ;;  %v812_v5 = vmax.f32 %v758_v48, 0.0 }
 0x130   :  { %v763_v4 = vpop.f32.mrf.mxu0  ;;  %v1007_v62 = vpop.f32.mrf.mxu1  ;;  %v1095_v31 = vmax.f32 %v1054_v6, %v1055_v2  ;;  %v1056_v35 = vmax.f32 %v1002_v7, 0.0 }
 0x131   :  { %v813_v32 = vmax.f32 %v760_v1, 0.0  ;;  %v764_v8 = vadd.f32 %v763_v4, %v1882_v40  ;;  %1093 = vmax.xlane.f32.xlu1 %v1092_v33  ;;  %852 = vmax.xlane.f32.xlu0 %v851_v29  ;;  %v1057_v14 = vmax.f32 %v1004_v3, 0.0  ;;  %v1008_v39 = vadd.f32 %v1007_v62, %v1882_v40  ;;  %v2057_v2 = vpop.permute.xlu0 %1220  ;;  %v2059_v3 = vpop.permute.xlu1 %1216 }
 0x132   :  { %v765_v10 = vpop.f32.mrf.mxu0  ;;  %v1009_v12 = vpop.f32.mrf.mxu1 }
 0x133   :  { %v854_v13 = vmax.f32 %v812_v5, %v813_v32  ;;  %v766_v19 = vadd.f32 %v765_v10, %v1882_v40  ;;  %v1010_v20 = vadd.f32 %v1009_v12, %v1882_v40  ;;  %v814_v36 = vmax.f32 %v764_v8, 0.0 }
 0x134   :  { %v769_v21 = vpop.f32.mrf.mxu0  ;;  %v1013_v24 = vpop.f32.mrf.mxu1  ;;  %v1098_v46 = vmax.f32 %v1056_v35, %v1057_v14  ;;  %v1058_v57 = vmax.f32 %v1008_v39, 0.0 }
 0x135   :  { %v770_v9 = vadd.f32 %v769_v21, %v1953_v52  ;;  %v815_v41 = vmax.f32 %v766_v19, 0.0  ;;  %855 = vmax.xlane.f32.xlu1 %v854_v13  ;;  %1096 = vmax.xlane.f32.xlu0 %v1095_v31  ;;  %v1059_v47 = vmax.f32 %v1010_v20, 0.0  ;;  %v1014_v59 = vadd.f32 %v1013_v24, %v1953_v52  ;;  %v2067_v39 = vpop.permute.xlu0 %1264 }
 0x136   :  { %v771_v42 = vpop.f32.mrf.mxu0  ;;  %v1015_v43 = vpop.f32.mrf.mxu1 }
 0x137   :  { %v772_v44 = vadd.f32 %v771_v42, %v1953_v52  ;;  %v1016_v28 = vadd.f32 %v1015_v43, %v1953_v52  ;;  %v857_v30 = vmax.f32 %v814_v36, %v815_v41  ;;  %v816_v37 = vmax.f32 %v770_v9, 0.0  ;;  %v2069_v41 = vpop.permute.xlu1 %1292 }
 0x138   :  { %v775_v48 = vpop.f32.mrf.mxu0  ;;  %v1019_v50 = vpop.f32.mrf.mxu1  ;;  %v1101_v7 = vmax.f32 %v1058_v57, %v1059_v47  ;;  %v1060_v8 = vmax.f32 %v1014_v59, 0.0 }
 0x139   :  { %v817_v51 = vmax.f32 %v772_v44, 0.0  ;;  %v776_v40 = vadd.f32 %v775_v48, %v1892_v60  ;;  %1099 = vmax.xlane.f32.xlu1 %v1098_v46  ;;  %858 = vmax.xlane.f32.xlu0 %v857_v30  ;;  %v1061_v62 = vmax.f32 %v1016_v28, 0.0  ;;  %v1020_v12 = vadd.f32 %v1019_v50, %v1892_v60 }
 0x13a   :  { %v777_v1 = vpop.f32.mrf.mxu0  ;;  %v1021_v33 = vpop.f32.mrf.mxu1 }
 0x13b   :  { %v860_v4 = vmax.f32 %v816_v37, %v817_v51  ;;  %v778_v29 = vadd.f32 %v777_v1, %v1892_v60  ;;  %v1022_v5 = vadd.f32 %v1021_v33, %v1892_v60  ;;  %v818_v10 = vmax.f32 %v776_v40, 0.0  ;;  %v2078_v33 = vpop.permute.xlu1 %1296 }
 0x13c   :  { %v781_v32 = vpop.f32.mrf.mxu0  ;;  %v1025_v6 = vpop.f32.mrf.mxu1  ;;  %v1104_v21 = vmax.f32 %v1060_v8, %v1061_v62  ;;  %v1062_v43 = vmax.f32 %v1020_v12, 0.0 }
 0x13d   :  { %v782_v52 = vadd.f32 %v781_v32, %v1967_v34  ;;  %v819_v13 = vmax.f32 %v778_v29, 0.0  ;;  %861 = vmax.xlane.f32.xlu1 %v860_v4  ;;  %1102 = vmax.xlane.f32.xlu0 %v1101_v7  ;;  %v1063_v24 = vmax.f32 %v1022_v5, 0.0  ;;  %v1026_v44 = vadd.f32 %v1025_v6, %v1967_v34 }
 0x13e   :  { %v783_v14 = vpop.f32.mrf.mxu0  ;;  %v1027_v19 = vpop.f32.mrf.mxu1 }
 0x13f   :  { %v784_v20 = vadd.f32 %v783_v14, %v1967_v34  ;;  %v1028_v31 = vadd.f32 %v1027_v19, %v1967_v34  ;;  %v863_v36 = vmax.f32 %v818_v10, %v819_v13  ;;  %v820_v42 = vmax.f32 %v782_v52, 0.0  ;;  %v2076_v34 = vpop.permute.xlu0 %1276  ;;  %v2082_v7 = vpop.permute.xlu1 %1224  ;;  %v1470_v19 = vld [vmem:[%s2234_s1 + $0x70] sm:$0xff] }
 0x140   :  { %v787_v9 = vpop.f32.mrf.mxu0  ;;  %v1031_v35 = vpop.f32.mrf.mxu1  ;;  %v1107_v51 = vmax.f32 %v1062_v43, %v1063_v24  ;;  %v1064_v57 = vmax.f32 %v1026_v44, 0.0 }
 0x141   :  { %v821_v60 = vmax.f32 %v784_v20, 0.0  ;;  %v788_v46 = vadd.f32 %v787_v9, %v1899_v18  ;;  %1105 = vmax.xlane.f32.xlu1 %v1104_v21  ;;  %864 = vmax.xlane.f32.xlu0 %v863_v36  ;;  %v1065_v50 = vmax.f32 %v1028_v31, 0.0  ;;  %v1032_v40 = vadd.f32 %v1031_v35, %v1899_v18  ;;  %v1471_v35 = vld [vmem:[%s2234_s1 + $0x78] sm:$0xff]  ;;  %s1498_s1 = smov [#allocation2]  }
 0x142   :  { %v789_v47 = vpop.f32.mrf.mxu0  ;;  %v1033_v28 = vpop.f32.mrf.mxu1  ;;  %s1373_s3 = sshll.u32 %s1498_s1, 4  ;;  %s1374_s3 = int_to_ptr.vmem [resolvable:$true] %s1373_s3 }
 0x143   :  { %v866_v48 = vmax.f32 %v820_v42, %v821_v60  ;;  %v790_v30 = vadd.f32 %v789_v47, %v1899_v18  ;;  %v1034_v37 = vadd.f32 %v1033_v28, %v1899_v18  ;;  %v822_v59 = vmax.f32 %v788_v46, 0.0  ;;  %v2080_v6 = vpop.permute.xlu0 %1288  ;;  %v2086_v52 = vpop.permute.xlu1 %1228  ;;  %s1472_s4 = scalar_lea.vmem %s1374_s3, 16  ;;  %s1476_s5 = scalar_lea.vmem %s1374_s3, 32 }
 0x144   :  { %v1110_v4 = vmax.f32 %v1064_v57, %v1065_v50  ;;  %v1066_v5 = vmax.f32 %v1032_v40, 0.0  ;;  %p1473_p0 = scmp.ne.s32.totalorder %s1374_s3, %s1472_s4  ;;  %p1477_p1 = scmp.lt.s32.totalorder %s1374_s3, %s1374_s3 }
 0x145   :  { %v823_v1 = vmax.f32 %v790_v30, 0.0  ;;  %867 = vmax.xlane.f32.xlu1 %v866_v48  ;;  %1108 = vmax.xlane.f32.xlu0 %v1107_v51  ;;  %v1067_v62 = vmax.f32 %v1034_v37, 0.0  ;;  %p1478_p2 = scmp.lt.s32.totalorder %s1476_s5, %s1472_s4 }
 0x147   :  { %v869_v29 = vmax.f32 %v822_v59, %v823_v1  ;;  %v1113_v32 = vmax.f32 %v1066_v5, %v1067_v62  ;;  %v2084_v18 = vpop.permute.xlu0 %1300  ;;  %p1479_p3 = por %p1478_p2, %p1477_p1 }
 0x149   :  { %1111 = vmax.xlane.f32.xlu1 %v1110_v4  ;;  %870 = vmax.xlane.f32.xlu0 %v869_v29  ;;  %p1480_p4 = pnand %p1479_p3, %p1473_p0 }
 0x14d   :  { %1114 = vmax.xlane.f32.xlu0 %v1113_v32 }
 0x156   :  { %v582_v8 = vpop.xlane.xlu1 %581  ;;  %v338_v10 = vpop.xlane.xlu0 %337 }
 0x157   :  { %v1117_v12 = vsel %vm1116_vm1, %v338_v10, %v582_v8 }
 0x15a   :  { %v341_v13 = vpop.xlane.xlu1 %340  ;;  %v585_v14 = vpop.xlane.xlu0 %584  ;;  %1304 = vperm.xlu1 %1469, %v1470_v19  }
 0x15b   :  { %v1118_v20 = vsel %vm1116_vm1, %v341_v13, %v585_v14 }
 0x15e   :  { %v588_v21 = vpop.xlane.xlu1 %587  ;;  %v344_v24 = vpop.xlane.xlu0 %343 }
 0x15f   :  { %v1119_v31 = vsel %vm1116_vm1, %v344_v24, %v588_v21 }
 0x162   :  { %v347_v9 = vpop.xlane.xlu0 %346 }
 0x163   :  { %1308 = vperm.xlu0 %1467, %v1471_v35  }
 0x166   :  { %v350_v36 = vpop.xlane.xlu1 %349  ;;  %v591_v42 = vpop.xlane.xlu0 %590 }
 0x167   :  { %v1120_v60 = vsel %vm1116_vm1, %v347_v9, %v591_v42 }
 0x16a   :  { %v594_v43 = vpop.xlane.xlu1 %593  ;;  %v353_v44 = vpop.xlane.xlu0 %352 }
 0x16b   :  { %v2099_v46 = vsel %vm1116_vm1, %v350_v36, %v594_v43 }
 0x16e   :  { %v356_v47 = vpop.xlane.xlu1 %355  ;;  %v597_v28 = vpop.xlane.xlu0 %596 }
 0x16f   :  { %v2102_v48 = vsel %vm1116_vm1, %v353_v44, %v597_v28 }
 0x172   :  { %v600_v50 = vpop.xlane.xlu1 %599  ;;  %v359_v30 = vpop.xlane.xlu0 %358 }
 0x173   :  { %v2105_v37 = vsel %vm1116_vm1, %v356_v47, %v600_v50 }
 0x176   :  { %v362_v51 = vpop.xlane.xlu1 %361  ;;  %v603_v57 = vpop.xlane.xlu0 %602 }
 0x177   :  { %v2108_v59 = vsel %vm1116_vm1, %v359_v30, %v603_v57 }
 0x17a   :  { %v606_v40 = vpop.xlane.xlu1 %605  ;;  %v365_v1 = vpop.xlane.xlu0 %364 }
 0x17b   :  { %v2111_v4 = vsel %vm1116_vm1, %v362_v51, %v606_v40 }
 0x17e   :  { %v368_v62 = vpop.xlane.xlu1 %367  ;;  %v609_v29 = vpop.xlane.xlu0 %608 }
 0x17f   :  { %v2114_v5 = vsel %vm1116_vm1, %v365_v1, %v609_v29 }
 0x182   :  { %v612_v32 = vpop.xlane.xlu1 %611  ;;  %v371_v8 = vpop.xlane.xlu0 %370 }
 0x183   :  { %v2117_v10 = vsel %vm1116_vm1, %v368_v62, %v612_v32 }
 0x186   :  { %v374_v13 = vpop.xlane.xlu1 %373  ;;  %v615_v14 = vpop.xlane.xlu0 %614 }
 0x187   :  { %v2120_v19 = vsel %vm1116_vm1, %v371_v8, %v615_v14 }
 0x18a   :  { %v618_v21 = vpop.xlane.xlu1 %617  ;;  %v377_v24 = vpop.xlane.xlu0 %376 }
 0x18b   :  { %v2123_v9 = vsel %vm1116_vm1, %v374_v13, %v618_v21 }
 0x18e   :  { %v2125_v35 = vpop.xlane.xlu1 %379  ;;  %v621_v36 = vpop.xlane.xlu0 %620 }
 0x18f   :  { %v2128_v42 = vsel %vm1116_vm1, %v377_v24, %v621_v36 }
 0x192   :  { %v2130_v43 = vpop.xlane.xlu1 %623  ;;  %v2132_v44 = vpop.xlane.xlu0 %382 }
 0x196   :  { %v826_v47 = vpop.xlane.xlu1 %825  ;;  %v2134_v28 = vpop.xlane.xlu0 %626 }
 0x197   :  { %v1134_v50 = vsel %vm1133_vm2, %v1117_v12, %v826_v47 }
 0x19a   :  { %v1070_v30 = vpop.xlane.xlu1 %1069  ;;  %v829_v51 = vpop.xlane.xlu0 %828 }
 0x19b   :  { %v1151_v57 = vsel %vm1150_vm3, %v1134_v50, %v1070_v30  ;;  %v1135_v1 = vsel %vm1133_vm2, %v1118_v20, %v829_v51 }
 0x19c   :  { %v1231_v40 = vmul.f32 %v1907_v38, %v1151_v57 }
 0x19e   :  { %v832_v62 = vpop.xlane.xlu1 %831  ;;  %v1073_v29 = vpop.xlane.xlu0 %1072  ;;  %v1311_v8 = vadd.f32 %v1945_v17, %v1231_v40 }
 0x19f   :  { %v1152_v32 = vsel %vm1150_vm3, %v1135_v1, %v1073_v29  ;;  %v1136_v14 = vsel %vm1133_vm2, %v1119_v31, %v832_v62 }
 0x1a0   :  { %v1232_v13 = vmul.f32 %v2027_v25, %v1152_v32  ;;  %v1328_v38 = vsel %vm1327_vm4, %v1311_v8, 0.0 }
 0x1a2   :  { %v1312_v12 = vadd.f32 %v1955_v53, %v1232_v13  ;;  %v1076_v21 = vpop.xlane.xlu1 %1075  ;;  %v835_v24 = vpop.xlane.xlu0 %834 }
 0x1a3   :  { %v1153_v36 = vsel %vm1150_vm3, %v1136_v14, %v1076_v21  ;;  %v1137_v25 = vsel %vm1133_vm2, %v1120_v60, %v835_v24 }
 0x1a4   :  { %v1329_v20 = vsel %vm1327_vm4, %v1312_v12, 0.0  ;;  %v1233_v47 = vmul.f32 %v1917_v63, %v1153_v36 }
 0x1a5   :  { %v1330_v50 = vadd.f32 %v1329_v20, %v1328_v38 }
 0x1a6   :  { %v1313_v17 = vadd.f32 %v1963_v16, %v1233_v47  ;;  %v838_v30 = vpop.xlane.xlu1 %837  ;;  %v1079_v51 = vpop.xlane.xlu0 %1078 }
 0x1a7   :  { %v1154_v31 = vsel %vm1150_vm3, %v1137_v25, %v1079_v51  ;;  %v1138_v1 = vsel %vm1133_vm2, %v2099_v46, %v838_v30 }
 0x1a8   :  { %v1331_v53 = vsel %vm1327_vm4, %v1313_v17, 0.0  ;;  %v1234_v57 = vmul.f32 %v1925_v22, %v1154_v31 }
 0x1a9   :  { %v1332_v40 = vadd.f32 %v1331_v53, %v1330_v50 }
 0x1aa   :  { %v1314_v62 = vadd.f32 %v1973_v56, %v1234_v57  ;;  %v1082_v63 = vpop.xlane.xlu1 %1081  ;;  %v841_v29 = vpop.xlane.xlu0 %840 }
 0x1ab   :  { %v1155_v16 = vsel %vm1150_vm3, %v1138_v1, %v1082_v63  ;;  %v1139_v22 = vsel %vm1133_vm2, %v2102_v48, %v841_v29 }
 0x1ac   :  { %v1333_v60 = vsel %vm1327_vm4, %v1314_v62, 0.0  ;;  %v1235_v32 = vmul.f32 %v1935_v55, %v1155_v16 }
 0x1ad   :  { %v1334_v8 = vadd.f32 %v1333_v60, %v1332_v40 }
 0x1ae   :  { %v1315_v13 = vadd.f32 %v2067_v39, %v1235_v32  ;;  %v844_v14 = vpop.xlane.xlu1 %843  ;;  %v1085_v12 = vpop.xlane.xlu0 %1084 }
 0x1af   :  { %v1156_v46 = vsel %vm1150_vm3, %v1139_v22, %v1085_v12  ;;  %v1140_v36 = vsel %vm1133_vm2, %v2105_v37, %v844_v14 }
 0x1b0   :  { %v1335_v56 = vsel %vm1327_vm4, %v1315_v13, 0.0  ;;  %v1236_v21 = vmul.f32 %v1979_v11, %v1156_v46 }
 0x1b1   :  { %v1336_v24 = vadd.f32 %v1335_v56, %v1334_v8 }
 0x1b2   :  { %v1316_v55 = vadd.f32 %v1995_v15, %v1236_v21  ;;  %v1088_v38 = vpop.xlane.xlu1 %1087  ;;  %v847_v20 = vpop.xlane.xlu0 %846 }
 0x1b3   :  { %v1157_v39 = vsel %vm1150_vm3, %v1140_v36, %v1088_v38  ;;  %v1141_v11 = vsel %vm1133_vm2, %v2108_v59, %v847_v20 }
 0x1b4   :  { %v1337_v48 = vsel %vm1327_vm4, %v1316_v55, 0.0  ;;  %v1237_v47 = vmul.f32 %v1987_v49, %v1157_v39 }
 0x1b5   :  { %v1338_v50 = vadd.f32 %v1337_v48, %v1336_v24 }
 0x1b6   :  { %v1317_v17 = vadd.f32 %v2003_v54, %v1237_v47  ;;  %v850_v25 = vpop.xlane.xlu1 %849  ;;  %v1091_v30 = vpop.xlane.xlu0 %1090 }
 0x1b7   :  { %v1158_v37 = vsel %vm1150_vm3, %v1141_v11, %v1091_v30  ;;  %v1142_v53 = vsel %vm1133_vm2, %v2111_v4, %v850_v25  ;;  %v1131_v25 = vsel %vm1116_vm1, %v2125_v35, %v2130_v43  ;;  %v1132_v35 = vsel %vm1116_vm1, %v2132_v44, %v2134_v28 }
 0x1b8   :  { %v1339_v15 = vsel %vm1327_vm4, %v1317_v17, 0.0  ;;  %v1238_v51 = vmul.f32 %v2037_v61, %v1158_v37 }
 0x1b9   :  { %v1340_v31 = vadd.f32 %v1339_v15, %v1338_v50 }
 0x1ba   :  { %v1318_v49 = vadd.f32 %v2076_v34, %v1238_v51  ;;  %v1094_v57 = vpop.xlane.xlu1 %1093  ;;  %v853_v40 = vpop.xlane.xlu0 %852 }
 0x1bb   :  { %v1159_v54 = vsel %vm1150_vm3, %v1142_v53, %v1094_v57  ;;  %v1143_v61 = vsel %vm1133_vm2, %v2114_v5, %v853_v40 }
 0x1bc   :  { %v1341_v59 = vsel %vm1327_vm4, %v1318_v49, 0.0  ;;  %v1239_v1 = vmul.f32 %v2011_v45, %v1159_v54 }
 0x1bd   :  { %v1342_v62 = vadd.f32 %v1341_v59, %v1340_v31 }
 0x1be   :  { %v1319_v63 = vadd.f32 %v2029_v23, %v1239_v1  ;;  %v856_v29 = vpop.xlane.xlu1 %855  ;;  %v1097_v16 = vpop.xlane.xlu0 %1096 }
 0x1bf   :  { %v1160_v4 = vsel %vm1150_vm3, %v1143_v61, %v1097_v16  ;;  %v1144_v8 = vsel %vm1133_vm2, %v2117_v10, %v856_v29 }
 0x1c0   :  { %v1343_v34 = vsel %vm1327_vm4, %v1319_v63, 0.0  ;;  %v1240_v60 = vmul.f32 %v2019_v58, %v1160_v4 }
 0x1c1   :  { %v1344_v32 = vadd.f32 %v1343_v34, %v1342_v62 }
 0x1c2   :  { %v1320_v45 = vadd.f32 %v2039_v0, %v1240_v60  ;;  %v1100_v13 = vpop.xlane.xlu1 %1099  ;;  %v859_v22 = vpop.xlane.xlu0 %858 }
 0x1c3   :  { %v1161_v23 = vsel %vm1150_vm3, %v1144_v8, %v1100_v13  ;;  %v1145_v58 = vsel %vm1133_vm2, %v2120_v19, %v859_v22 }
 0x1c4   :  { %v1345_v5 = vsel %vm1327_vm4, %v1320_v45, 0.0  ;;  %v1241_v14 = vmul.f32 %v2047_v26, %v1161_v23 }
 0x1c5   :  { %v1346_v12 = vadd.f32 %v1345_v5, %v1344_v32 }
 0x1c6   :  { %v1321_v46 = vadd.f32 %v2080_v6, %v1241_v14  ;;  %v862_v56 = vpop.xlane.xlu1 %861  ;;  %v1103_v21 = vpop.xlane.xlu0 %1102 }
 0x1c7   :  { %v1162_v10 = vsel %vm1150_vm3, %v1145_v58, %v1103_v21  ;;  %v1146_v55 = vsel %vm1133_vm2, %v2123_v9, %v862_v56 }
 0x1c8   :  { %v1347_v0 = vsel %vm1327_vm4, %v1321_v46, 0.0  ;;  %v1242_v24 = vmul.f32 %v2049_v27, %v1162_v10 }
 0x1c9   :  { %v1348_v36 = vadd.f32 %v1347_v0, %v1346_v12 }
 0x1ca   :  { %v1322_v26 = vadd.f32 %v2069_v41, %v1242_v24  ;;  %v1106_v38 = vpop.xlane.xlu1 %1105  ;;  %v865_v20 = vpop.xlane.xlu0 %864 }
 0x1cb   :  { %v1163_v6 = vsel %vm1150_vm3, %v1146_v55, %v1106_v38  ;;  %v1147_v27 = vsel %vm1133_vm2, %v2128_v42, %v865_v20 }
 0x1cc   :  { %v1349_v19 = vsel %vm1327_vm4, %v1322_v26, 0.0  ;;  %v1243_v39 = vmul.f32 %v2059_v3, %v1163_v6 }
 0x1cd   :  { %v1350_v48 = vadd.f32 %v1349_v19, %v1348_v36 }
 0x1ce   :  { %v1323_v47 = vadd.f32 %v2078_v33, %v1243_v39  ;;  %v868_v50 = vpop.xlane.xlu1 %867  ;;  %v1109_v17 = vpop.xlane.xlu0 %1108 }
 0x1cf   :  { %v1164_v9 = vsel %vm1150_vm3, %v1147_v27, %v1109_v17  ;;  %v1148_v3 = vsel %vm1133_vm2, %v1131_v25, %v868_v50 }
 0x1d0   :  { %v1351_v41 = vsel %vm1327_vm4, %v1323_v47, 0.0  ;;  %v1244_v11 = vmul.f32 %v2057_v2, %v1164_v9 }
 0x1d1   :  { %v1352_v30 = vadd.f32 %v1351_v41, %v1350_v48 }
 0x1d2   :  { %v1324_v33 = vadd.f32 %v2084_v18, %v1244_v11  ;;  %v1112_v37 = vpop.xlane.xlu1 %1111  ;;  %v871_v15 = vpop.xlane.xlu0 %870 }
 0x1d3   :  { %v1165_v42 = vsel %vm1150_vm3, %v1148_v3, %v1112_v37  ;;  %v1149_v43 = vsel %vm1133_vm2, %v1132_v35, %v871_v15 }
 0x1d4   :  { %v1245_v51 = vmul.f32 %v2082_v7, %v1165_v42  ;;  %v1353_v31 = vsel %vm1327_vm4, %v1324_v33, 0.0 }
 0x1d5   :  { %v1354_v53 = vadd.f32 %v1353_v31, %v1352_v30 }
 0x1d6   :  { %v1305_v49 = vpop.permute.xlu1 %1304  ;;  %v1115_v57 = vpop.xlane.xlu0 %1114 }
 0x1d7   :  { %v1325_v2 = vadd.f32 %v1305_v49, %v1245_v51  ;;  %v1166_v54 = vsel %vm1150_vm3, %v1149_v43, %v1115_v57 }
 0x1d8   :  { %v1246_v59 = vmul.f32 %v2086_v52, %v1166_v54 }
 0x1d9   :  { %v1355_v18 = vsel %vm1327_vm4, %v1325_v2, 0.0 }
 0x1da   :  { %v1356_v40 = vadd.f32 %v1355_v18, %v1354_v53 }
 0x1de   :  { %v1309_v7 = vpop.permute.xlu0 %1308 }
 0x1df   :  { %v1326_v1 = vadd.f32 %v1309_v7, %v1246_v59 }
 0x1e1   :  { %v1357_v62 = vsel %vm1327_vm4, %v1326_v1, 0.0 }
 0x1e2   :  { %v1358_v63 = vadd.f32 %v1357_v62, %v1356_v40 }
 0x1e4   :  { %v1359_v61 = vrot.slane %v1358_v63, 4 }
 0x1e6   :  { %v1360_v29 = vadd.f32 %v1359_v61, %v1358_v63 }
 0x1e8   :  { %v1361_v16 = vrot.slane %v1360_v29, 2 }
 0x1ea   :  { %v1362_v4 = vadd.f32 %v1361_v16, %v1360_v29 }
 0x1ec   :  { %v1363_v44 = vrot.slane %v1362_v4, 1 }
 0x1ee   :  { %v1364_v28 = vadd.f32 %v1363_v44, %v1362_v4 }
 0x1f0   :  { %1366 = vst.msk [vmem:[#allocation2] sm:$0x1] %vm1365_vm5, %v1364_v28 }
 0x1f1   :  { %1483 = shalt.err (!%p1480_p4)
}
 0x1f2   :  { %1376 = dma.vmem_to_hbm [thread:$0]  %s1374_s3, 16, %s2235_s2, [#allocation3]  }
 0x1f3   :  { %1492 = dma.done.wait [#allocation3], 16  }
 0x1f4   :  { %1493 = vsyncadd [#allocation3], 4294967280 }
 0x1f5   :  { %1380 = vsyncpa [#allocation3], 1 }

</bundles_post_ra>
